<compile_context>
chip_gen: v7x
topology: tpu7x:2x2x1
jax: 0.10.0
libtpu: 0.0.40
codegen_flags: <defaults>
</compile_context>

<pallas_src>
import jax
import jax.numpy as jnp
from jax.experimental import pallas as pl
from jax.experimental.pallas import tpu as pltpu

EMBED_DIM = 32
NUM_HEADS = 4
HEAD_DIM = EMBED_DIM // NUM_HEADS
NEG_INF = -1e30  # large negative instead of -inf so fully-masked rows stay finite

# TODO(synk): attention dropout (constructor arg dropout>0) is not implemented;
# this kernel covers the inference/eval forward (dropout=0.0).


def _mhca_body(x_ref, y_ref, mask_ref,
               wq_ref, bq_ref, wk_ref, bk_ref, wv_ref, bv_ref, wo_ref, bo_ref,
               o_ref):
    TB, Lq, E = x_ref.shape
    _, Lk, _ = y_ref.shape
    H = wq_ref.shape[0]

    x = x_ref[...].astype(jnp.float32)            # (TB, Lq, E)
    y = y_ref[...].astype(jnp.float32)            # (TB, Lk, E)
    xf = x.reshape(TB * Lq, E)                    # leading-dim merge: free
    yf = y.reshape(TB * Lk, E)

    if mask_ref is not None:
        mask_row = mask_ref[...]                  # (TB, Lk) int32, 1 == ignore key
        # Additive key bias, materialized/broadcast ONCE (not per head).
        kbias = jnp.where((mask_row != 0)[:, None, :], NEG_INF, 0.0).astype(jnp.float32)
        kbias = jnp.broadcast_to(kbias, (TB, Lq, Lk))
    else:
        kbias = None

    # Per-head accumulation of the output projection -> no lane concat.
    out_acc = jnp.zeros((TB * Lq, E), jnp.float32) + bo_ref[...].astype(jnp.float32)

    for h in range(H):                            # H = 4, fully unrolled
        wq = wq_ref[h].astype(jnp.float32)        # (E, Dh)  (scale pre-folded)
        wk = wk_ref[h].astype(jnp.float32)        # (E, Dh)
        wv = wv_ref[h].astype(jnp.float32)        # (E, Dh)
        wo = wo_ref[h].astype(jnp.float32)        # (Dh, E)

        qh = (jnp.dot(xf, wq, preferred_element_type=jnp.float32)
              + bq_ref[h].astype(jnp.float32)).reshape(TB, Lq, -1)
        kh = (jnp.dot(yf, wk, preferred_element_type=jnp.float32)
              + bk_ref[h].astype(jnp.float32)).reshape(TB, Lk, -1)
        vh = (jnp.dot(yf, wv, preferred_element_type=jnp.float32)
              + bv_ref[h].astype(jnp.float32)).reshape(TB, Lk, -1)

        s = jnp.einsum("bqd,bkd->bqk", qh, kh,
                       preferred_element_type=jnp.float32)        # (TB, Lq, Lk)
        if kbias is not None:
            s = s + kbias
        s = s - jnp.max(s, axis=-1, keepdims=True)
        p = jnp.exp(s)
        p = p * pl.reciprocal(jnp.sum(p, axis=-1, keepdims=True), approx=True)
        oh = jnp.einsum("bqk,bkd->bqd", p, vh,
                        preferred_element_type=jnp.float32)       # (TB, Lq, Dh)
        out_acc = out_acc + jnp.dot(oh.reshape(TB * Lq, -1), wo,
                                    preferred_element_type=jnp.float32)

    out = out_acc.reshape(TB, Lq, E)

    if mask_ref is not None:
        # Fused fully-masked-batch passthrough (torch: those rows return x).
        has_valid = jnp.max(jnp.where(mask_row == 0, 1.0, 0.0),
                            axis=-1, keepdims=True) > 0.5          # (TB, 1)
        out = jnp.where(has_valid[:, :, None], out, x)

    o_ref[...] = out.astype(o_ref.dtype)


def _mhca_kernel_nomask(x_ref, y_ref, wq_ref, bq_ref, wk_ref, bk_ref,
                        wv_ref, bv_ref, wo_ref, bo_ref, o_ref):
    _mhca_body(x_ref, y_ref, None, wq_ref, bq_ref, wk_ref, bk_ref,
               wv_ref, bv_ref, wo_ref, bo_ref, o_ref)


def _mhca_kernel_masked(x_ref, y_ref, mask_ref, wq_ref, bq_ref, wk_ref, bk_ref,
                        wv_ref, bv_ref, wo_ref, bo_ref, o_ref):
    _mhca_body(x_ref, y_ref, mask_ref, wq_ref, bq_ref, wk_ref, bk_ref,
               wv_ref, bv_ref, wo_ref, bo_ref, o_ref)


def _prepare_weights(params):
    """Split nn.MultiheadAttention packed weights into per-head stacks (host side).

    The kernel never lane-slices weights or activations, and the softmax
    1/sqrt(Dh) scale is folded into the q projection.
    """
    wi, bi, wo, bo = params
    E, H, Dh = EMBED_DIM, NUM_HEADS, HEAD_DIM
    scale = 1.0 / float(Dh) ** 0.5
    wq = wi[:, :E] * scale
    wk = wi[:, E:2 * E]
    wv = wi[:, 2 * E:]
    bq = bi[:E] * scale
    bk = bi[E:2 * E]
    bv = bi[2 * E:]
    wq_h = wq.reshape(E, H, Dh).transpose(1, 0, 2)   # (H, E, Dh)
    wk_h = wk.reshape(E, H, Dh).transpose(1, 0, 2)
    wv_h = wv.reshape(E, H, Dh).transpose(1, 0, 2)
    bq_h = bq.reshape(H, 1, Dh)
    bk_h = bk.reshape(H, 1, Dh)
    bv_h = bv.reshape(H, 1, Dh)
    wo_h = wo.reshape(H, Dh, E)                      # head h's out-proj slice
    bo2 = bo.reshape(1, E)
    return wq_h, bq_h, wk_h, bk_h, wv_h, bv_h, wo_h, bo2


def _pick_batch_tile(B, batch_tile):
    if batch_tile is not None:
        tb = int(batch_tile)
    elif B > 8:
        # <= 256 rows/step (v7x 64 MiB VMEM headroom) and >= 2 steps so a v7x
        # megacore can split the "parallel" batch axis across both cores.
        tb = min(256, pl.cdiv(B, 2))
    else:
        tb = B
    return max(8, ((tb + 7) // 8) * 8)   # multiple of 8: clean sublane tiling


def multi_head_cross_atten(x, y, params, mask=None, batch_tile=None):
    """Pallas equivalent of MultiHeadCrossAtten.forward(x, y, mask)."""
    B, Lq, E = x.shape
    _, Lk, _ = y.shape
    assert E == EMBED_DIM

    weights = _prepare_weights(params)
    H, Dh = NUM_HEADS, HEAD_DIM

    tb = _pick_batch_tile(B, batch_tile)
    nb = pl.cdiv(B, tb)
    Bp = nb * tb
    if Bp != B:
        pad3 = ((0, Bp - B), (0, 0), (0, 0))
        xp, yp = jnp.pad(x, pad3), jnp.pad(y, pad3)
    else:
        xp, yp = x, y

    io_x = pl.BlockSpec((tb, Lq, E), lambda b: (b, 0, 0))
    io_y = pl.BlockSpec((tb, Lk, E), lambda b: (b, 0, 0))
    out_spec = pl.BlockSpec((tb, Lq, E), lambda b: (b, 0, 0))
    # Constant-indexed weight blocks stay VMEM-resident across grid steps.
    w_specs = [
        pl.BlockSpec((H, E, Dh), lambda b: (0, 0, 0)),   # wq (pre-scaled)
        pl.BlockSpec((H, 1, Dh), lambda b: (0, 0, 0)),   # bq (pre-scaled)
        pl.BlockSpec((H, E, Dh), lambda b: (0, 0, 0)),   # wk
        pl.BlockSpec((H, 1, Dh), lambda b: (0, 0, 0)),   # bk
        pl.BlockSpec((H, E, Dh), lambda b: (0, 0, 0)),   # wv
        pl.BlockSpec((H, 1, Dh), lambda b: (0, 0, 0)),   # bv
        pl.BlockSpec((H, Dh, E), lambda b: (0, 0, 0)),   # wo
        pl.BlockSpec((1, E), lambda b: (0, 0)),          # bo
    ]
    common = dict(
        out_shape=jax.ShapeDtypeStruct((Bp, Lq, E), x.dtype),
        compiler_params=pltpu.CompilerParams(
            dimension_semantics=("parallel",),
            vmem_limit_bytes=32 * 1024 * 1024,
        ),
    )

    if mask is None:
        out = pl.pallas_call(
            _mhca_kernel_nomask,
            grid_spec=pltpu.PrefetchScalarGridSpec(
                num_scalar_prefetch=0,
                grid=(nb,),
                in_specs=[io_x, io_y] + w_specs,
                out_specs=out_spec,
            ),
            **common,
        )(xp, yp, *weights)
        return out[:B]

    # 2-D int32 mask; padded batch rows stay all-zero (= valid), so the fused
    # in-kernel passthrough never triggers on padding.
    mask_i32 = mask.astype(jnp.int32)
    if Bp != B:
        mask_i32 = jnp.pad(mask_i32, ((0, Bp - B), (0, 0)))
    mask_spec = pl.BlockSpec((tb, Lk), lambda b: (b, 0))

    out = pl.pallas_call(
        _mhca_kernel_masked,
        grid_spec=pltpu.PrefetchScalarGridSpec(
            num_scalar_prefetch=0,
            grid=(nb,),
            in_specs=[io_x, io_y, mask_spec] + w_specs,
            out_specs=out_spec,
        ),
        **common,
    )(xp, yp, mask_i32, *weights)
    return out[:B]


def mha_reference(x, y, params, mask=None):
    """Pure-JAX reference with the same math (for correctness check)."""
    wi, bi, wo, bo = params
    E, H, Dh = EMBED_DIM, NUM_HEADS, HEAD_DIM
    B, Lq, _ = x.shape
    Lk = y.shape[1]
    q = x @ wi[:, :E] + bi[:E]
    k = y @ wi[:, E:2 * E] + bi[E:2 * E]
    v = y @ wi[:, 2 * E:] + bi[2 * E:]
    qh = q.reshape(B, Lq, H, Dh).transpose(0, 2, 1, 3)
    kh = k.reshape(B, Lk, H, Dh).transpose(0, 2, 1, 3)
    vh = v.reshape(B, Lk, H, Dh).transpose(0, 2, 1, 3)
    s = jnp.einsum("bhqd,bhkd->bhqk", qh, kh) / jnp.sqrt(float(Dh))
    if mask is not None:
        s = s + jnp.where(mask, NEG_INF, 0.0)[:, None, None, :]
    p = jax.nn.softmax(s, axis=-1)
    o = jnp.einsum("bhqk,bhkd->bhqd", p, vh)
    o = o.transpose(0, 2, 1, 3).reshape(B, Lq, E)
    out = o @ wo + bo
    if mask is not None:
        valid = jnp.any(jnp.logical_not(mask), axis=1)
        out = jnp.where(valid[:, None, None], out, x)
    return out


def init_params(key):
    # Deterministic synthetic init of nn.MultiheadAttention parameters:
    #   in_proj_weight (3E, E) -> stored transposed as (E, 3E)
    #   in_proj_bias   (3E,)
    #   out_proj.weight (E, E) -> stored transposed as (E, E)
    #   out_proj.bias   (E,)
    E = EMBED_DIM
    k1, k2, k3, k4 = jax.random.split(key, 4)
    wi = jax.random.normal(k1, (E, 3 * E), jnp.float32) * 0.05
    bi = jax.random.normal(k2, (3 * E,), jnp.float32) * 0.01
    wo = jax.random.normal(k3, (E, E), jnp.float32) * 0.05
    bo = jax.random.normal(k4, (E,), jnp.float32) * 0.01
    return wi, bi, wo, bo


if __name__ == "__main__":
    B, Lq, Lk, E = 2, 8, 8, EMBED_DIM
    key = jax.random.PRNGKey(0)
    kx, ky, kp = jax.random.split(key, 3)
    x = jax.random.normal(kx, (B, Lq, E), jnp.float32)
    y = jax.random.normal(ky, (B, Lk, E), jnp.float32)
    params = init_params(kp)

    # Case 1: mask=None (main path of the torch module).
    out = jax.block_until_ready(multi_head_cross_atten(x, y, params, mask=None))
    ref = mha_reference(x, y, params, mask=None)
    assert jnp.allclose(out, ref, atol=2e-3, rtol=2e-3), "mismatch (mask=None)"

    # Case 2: key_padding_mask with one fully-masked batch row (fused in-kernel
    # passthrough: that row's output must equal its input x).
    mask = jnp.zeros((B, Lk), bool).at[1, :].set(True).at[0, Lk // 2:].set(True)
    out_m = jax.block_until_ready(multi_head_cross_atten(x, y, params, mask=mask))
    ref_m = mha_reference(x, y, params, mask=mask)
    assert jnp.allclose(out_m, ref_m, atol=2e-3, rtol=2e-3), "mismatch (masked)"
    assert jnp.allclose(out_m[1], x[1]), "fully-masked batch must pass x through"

    # Case 3: exercise batch tiling + padding (B=20, tile=8 -> grid of 3 steps).
    B2 = 20
    kx2, ky2, km2 = jax.random.split(jax.random.PRNGKey(1), 3)
    x2 = jax.random.normal(kx2, (B2, Lq, E), jnp.float32)
    y2 = jax.random.normal(ky2, (B2, Lk, E), jnp.float32)
    out2 = jax.block_until_ready(
        multi_head_cross_atten(x2, y2, params, mask=None, batch_tile=8))
    ref2 = mha_reference(x2, y2, params, mask=None)
    assert jnp.allclose(out2, ref2, atol=2e-3, rtol=2e-3), "mismatch (batch-tiled)"

    # Case 4: masked + tiled, with some fully-masked rows.
    mask2 = jax.random.bernoulli(km2, 0.3, (B2, Lk))
    mask2 = mask2.at[:, 0].set(False)                        # >=1 valid key per row
    mask2 = mask2.at[3, :].set(True).at[17, :].set(True)     # rows 3, 17 fully masked
    out2m = jax.block_until_ready(
        multi_head_cross_atten(x2, y2, params, mask=mask2, batch_tile=8))
    ref2m = mha_reference(x2, y2, params, mask=mask2)
    assert jnp.allclose(out2m, ref2m, atol=2e-3, rtol=2e-3), "mismatch (masked, tiled)"
    assert jnp.allclose(out2m[3], x2[3]) and jnp.allclose(out2m[17], x2[17]), \
        "fully-masked batches must pass x through"

    print("KERNEL_OK")
</pallas_src>

<mosaic_0001>
module attributes {stable_mosaic.version = 11 : i64} {
  func.func @_mhca_kernel_nomask(%arg0: i32, %arg1: memref<8x8x32xf32, #tpu.memory_space<vmem>>, %arg2: memref<8x8x32xf32, #tpu.memory_space<vmem>>, %arg3: memref<4x32x8xf32, #tpu.memory_space<vmem>>, %arg4: memref<4x1x8xf32, #tpu.memory_space<vmem>>, %arg5: memref<4x32x8xf32, #tpu.memory_space<vmem>>, %arg6: memref<4x1x8xf32, #tpu.memory_space<vmem>>, %arg7: memref<4x32x8xf32, #tpu.memory_space<vmem>>, %arg8: memref<4x1x8xf32, #tpu.memory_space<vmem>>, %arg9: memref<4x8x32xf32, #tpu.memory_space<vmem>>, %arg10: memref<1x32xf32, #tpu.memory_space<vmem>>, %arg11: memref<8x8x32xf32, #tpu.memory_space<vmem>>) attributes {dimension_semantics = [#tpu.dimension_semantics<parallel>], iteration_bounds = array<i64: 1>, scalar_prefetch = 0 : i64, scratch_operands = 0 : i64, tpu.core_type = #tpu.core_type<tc>, window_params = [{transform_indices = @transform_0, window_bounds = array<i64: 8, 8, 32>}, {transform_indices = @transform_1, window_bounds = array<i64: 8, 8, 32>}, {pipeline_mode = #tpu.pipeline_mode<synchronous>, transform_indices = @transform_2, window_bounds = array<i64: 4, 32, 8>}, {pipeline_mode = #tpu.pipeline_mode<synchronous>, transform_indices = @transform_3, window_bounds = array<i64: 4, 1, 8>}, {pipeline_mode = #tpu.pipeline_mode<synchronous>, transform_indices = @transform_4, window_bounds = array<i64: 4, 32, 8>}, {pipeline_mode = #tpu.pipeline_mode<synchronous>, transform_indices = @transform_5, window_bounds = array<i64: 4, 1, 8>}, {pipeline_mode = #tpu.pipeline_mode<synchronous>, transform_indices = @transform_6, window_bounds = array<i64: 4, 32, 8>}, {pipeline_mode = #tpu.pipeline_mode<synchronous>, transform_indices = @transform_7, window_bounds = array<i64: 4, 1, 8>}, {pipeline_mode = #tpu.pipeline_mode<synchronous>, transform_indices = @transform_8, window_bounds = array<i64: 4, 8, 32>}, {pipeline_mode = #tpu.pipeline_mode<synchronous>, transform_indices = @transform_9, window_bounds = array<i64: 1, 32>}, {transform_indices = @transform_10, window_bounds = array<i64: 8, 8, 32>}]} {
    %c0 = arith.constant 0 : index
    %c0_0 = arith.constant 0 : index
    %c0_1 = arith.constant 0 : index
    %0 = vector.load %arg1[%c0, %c0_0, %c0_1] : memref<8x8x32xf32, #tpu.memory_space<vmem>>, vector<8x8x32xf32>
    %c0_2 = arith.constant 0 : index
    %c0_3 = arith.constant 0 : index
    %c0_4 = arith.constant 0 : index
    %1 = vector.load %arg2[%c0_2, %c0_3, %c0_4] : memref<8x8x32xf32, #tpu.memory_space<vmem>>, vector<8x8x32xf32>
    %2 = vector.shape_cast %0 : vector<8x8x32xf32> to vector<64x32xf32>
    %3 = vector.shape_cast %1 : vector<8x8x32xf32> to vector<64x32xf32>
    %cst = arith.constant 0.000000e+00 : f32
    %4 = vector.broadcast %cst : f32 to vector<64x32xf32>
    %c0_5 = arith.constant 0 : index
    %c0_6 = arith.constant 0 : index
    %5 = vector.load %arg10[%c0_5, %c0_6] : memref<1x32xf32, #tpu.memory_space<vmem>>, vector<1x32xf32>
    %6 = vector.broadcast %5 : vector<1x32xf32> to vector<64x32xf32>
    %7 = arith.addf %4, %6 : vector<64x32xf32>
    %c0_7 = arith.constant 0 : index
    %c0_8 = arith.constant 0 : index
    %c0_9 = arith.constant 0 : index
    %8 = vector.load %arg3[%c0_7, %c0_8, %c0_9] : memref<4x32x8xf32, #tpu.memory_space<vmem>>, vector<1x32x8xf32>
    %9 = vector.shape_cast %8 : vector<1x32x8xf32> to vector<32x8xf32>
    %c0_10 = arith.constant 0 : index
    %c0_11 = arith.constant 0 : index
    %c0_12 = arith.constant 0 : index
    %10 = vector.load %arg5[%c0_10, %c0_11, %c0_12] : memref<4x32x8xf32, #tpu.memory_space<vmem>>, vector<1x32x8xf32>
    %11 = vector.shape_cast %10 : vector<1x32x8xf32> to vector<32x8xf32>
    %c0_13 = arith.constant 0 : index
    %c0_14 = arith.constant 0 : index
    %c0_15 = arith.constant 0 : index
    %12 = vector.load %arg7[%c0_13, %c0_14, %c0_15] : memref<4x32x8xf32, #tpu.memory_space<vmem>>, vector<1x32x8xf32>
    %13 = vector.shape_cast %12 : vector<1x32x8xf32> to vector<32x8xf32>
    %c0_16 = arith.constant 0 : index
    %c0_17 = arith.constant 0 : index
    %c0_18 = arith.constant 0 : index
    %14 = vector.load %arg9[%c0_16, %c0_17, %c0_18] : memref<4x8x32xf32, #tpu.memory_space<vmem>>, vector<1x8x32xf32>
    %15 = vector.shape_cast %14 : vector<1x8x32xf32> to vector<8x32xf32>
    %cst_19 = arith.constant dense<0.000000e+00> : vector<64x8xf32>
    %16 = tpu.matmul %2, %9, %cst_19 {dimension_numbers = #tpu.dot_dimension_numbers<[1], [0], [0], [1], [0, 0, 1, 1], [], []>} : vector<64x32xf32>, vector<32x8xf32>, vector<64x8xf32> -> vector<64x8xf32>
    %c0_20 = arith.constant 0 : index
    %c0_21 = arith.constant 0 : index
    %c0_22 = arith.constant 0 : index
    %17 = vector.load %arg4[%c0_20, %c0_21, %c0_22] : memref<4x1x8xf32, #tpu.memory_space<vmem>>, vector<1x1x8xf32>
    %18 = vector.shape_cast %17 : vector<1x1x8xf32> to vector<1x8xf32>
    %19 = vector.broadcast %18 : vector<1x8xf32> to vector<64x8xf32>
    %20 = arith.addf %16, %19 : vector<64x8xf32>
    %21 = vector.shape_cast %20 : vector<64x8xf32> to vector<8x8x8xf32>
    %cst_23 = arith.constant dense<0.000000e+00> : vector<64x8xf32>
    %22 = tpu.matmul %3, %11, %cst_23 {dimension_numbers = #tpu.dot_dimension_numbers<[1], [0], [0], [1], [0, 0, 1, 1], [], []>} : vector<64x32xf32>, vector<32x8xf32>, vector<64x8xf32> -> vector<64x8xf32>
    %c0_24 = arith.constant 0 : index
    %c0_25 = arith.constant 0 : index
    %c0_26 = arith.constant 0 : index
    %23 = vector.load %arg6[%c0_24, %c0_25, %c0_26] : memref<4x1x8xf32, #tpu.memory_space<vmem>>, vector<1x1x8xf32>
    %24 = vector.shape_cast %23 : vector<1x1x8xf32> to vector<1x8xf32>
    %25 = vector.broadcast %24 : vector<1x8xf32> to vector<64x8xf32>
    %26 = arith.addf %22, %25 : vector<64x8xf32>
    %27 = vector.shape_cast %26 : vector<64x8xf32> to vector<8x8x8xf32>
    %cst_27 = arith.constant dense<0.000000e+00> : vector<64x8xf32>
    %28 = tpu.matmul %3, %13, %cst_27 {dimension_numbers = #tpu.dot_dimension_numbers<[1], [0], [0], [1], [0, 0, 1, 1], [], []>} : vector<64x32xf32>, vector<32x8xf32>, vector<64x8xf32> -> vector<64x8xf32>
    %c0_28 = arith.constant 0 : index
    %c0_29 = arith.constant 0 : index
    %c0_30 = arith.constant 0 : index
    %29 = vector.load %arg8[%c0_28, %c0_29, %c0_30] : memref<4x1x8xf32, #tpu.memory_space<vmem>>, vector<1x1x8xf32>
    %30 = vector.shape_cast %29 : vector<1x1x8xf32> to vector<1x8xf32>
    %31 = vector.broadcast %30 : vector<1x8xf32> to vector<64x8xf32>
    %32 = arith.addf %28, %31 : vector<64x8xf32>
    %33 = vector.shape_cast %32 : vector<64x8xf32> to vector<8x8x8xf32>
    "tpu.trace_start"() <{level = 10 : i32, message = "bqd,bkd->bqk"}> : () -> ()
    %cst_31 = arith.constant dense<0.000000e+00> : vector<8x8x8xf32>
    %34 = tpu.matmul %21, %27, %cst_31 {dimension_numbers = #tpu.dot_dimension_numbers<[2], [2], [1], [1], [0, 0, 0, 1, 1, 1], [0], [0]>} : vector<8x8x8xf32>, vector<8x8x8xf32>, vector<8x8x8xf32> -> vector<8x8x8xf32>
    "tpu.trace_stop"() : () -> ()
    %cst_32 = arith.constant dense<0xFF800000> : vector<8x8xf32>
    %35 = vector.multi_reduction <maximumf>, %34, %cst_32 [2] : vector<8x8x8xf32> to vector<8x8xf32>
    %36 = vector.shape_cast %35 : vector<8x8xf32> to vector<8x8x1xf32>
    %37 = vector.broadcast %36 : vector<8x8x1xf32> to vector<8x8x8xf32>
    %38 = arith.subf %34, %37 : vector<8x8x8xf32>
    %39 = math.exp %38 : vector<8x8x8xf32>
    %cst_33 = arith.constant dense<0.000000e+00> : vector<8x8xf32>
    %40 = vector.multi_reduction <add>, %39, %cst_33 [2] : vector<8x8x8xf32> to vector<8x8xf32>
    %41 = vector.shape_cast %40 : vector<8x8xf32> to vector<8x8x1xf32>
    %42 = tpu.reciprocal %41 {approx = true} : vector<8x8x1xf32> -> vector<8x8x1xf32>
    %43 = vector.broadcast %42 : vector<8x8x1xf32> to vector<8x8x8xf32>
    %44 = arith.mulf %39, %43 : vector<8x8x8xf32>
    "tpu.trace_start"() <{level = 10 : i32, message = "bqk,bkd->bqd"}> : () -> ()
    %cst_34 = arith.constant dense<0.000000e+00> : vector<8x8x8xf32>
    %45 = tpu.matmul %44, %33, %cst_34 {dimension_numbers = #tpu.dot_dimension_numbers<[2], [1], [1], [2], [0, 0, 0, 1, 1, 2], [0], [0]>} : vector<8x8x8xf32>, vector<8x8x8xf32>, vector<8x8x8xf32> -> vector<8x8x8xf32>
    "tpu.trace_stop"() : () -> ()
    %46 = vector.shape_cast %45 : vector<8x8x8xf32> to vector<64x8xf32>
    %cst_35 = arith.constant dense<0.000000e+00> : vector<64x32xf32>
    %47 = tpu.matmul %46, %15, %cst_35 {dimension_numbers = #tpu.dot_dimension_numbers<[1], [0], [0], [1], [0, 0, 1, 1], [], []>} : vector<64x8xf32>, vector<8x32xf32>, vector<64x32xf32> -> vector<64x32xf32>
    %48 = arith.addf %7, %47 : vector<64x32xf32>
    %c1 = arith.constant 1 : index
    %c0_36 = arith.constant 0 : index
    %c0_37 = arith.constant 0 : index
    %49 = vector.load %arg3[%c1, %c0_36, %c0_37] : memref<4x32x8xf32, #tpu.memory_space<vmem>>, vector<1x32x8xf32>
    %50 = vector.shape_cast %49 : vector<1x32x8xf32> to vector<32x8xf32>
    %c1_38 = arith.constant 1 : index
    %c0_39 = arith.constant 0 : index
    %c0_40 = arith.constant 0 : index
    %51 = vector.load %arg5[%c1_38, %c0_39, %c0_40] : memref<4x32x8xf32, #tpu.memory_space<vmem>>, vector<1x32x8xf32>
    %52 = vector.shape_cast %51 : vector<1x32x8xf32> to vector<32x8xf32>
    %c1_41 = arith.constant 1 : index
    %c0_42 = arith.constant 0 : index
    %c0_43 = arith.constant 0 : index
    %53 = vector.load %arg7[%c1_41, %c0_42, %c0_43] : memref<4x32x8xf32, #tpu.memory_space<vmem>>, vector<1x32x8xf32>
    %54 = vector.shape_cast %53 : vector<1x32x8xf32> to vector<32x8xf32>
    %c1_44 = arith.constant 1 : index
    %c0_45 = arith.constant 0 : index
    %c0_46 = arith.constant 0 : index
    %55 = vector.load %arg9[%c1_44, %c0_45, %c0_46] : memref<4x8x32xf32, #tpu.memory_space<vmem>>, vector<1x8x32xf32>
    %56 = vector.shape_cast %55 : vector<1x8x32xf32> to vector<8x32xf32>
    %cst_47 = arith.constant dense<0.000000e+00> : vector<64x8xf32>
    %57 = tpu.matmul %2, %50, %cst_47 {dimension_numbers = #tpu.dot_dimension_numbers<[1], [0], [0], [1], [0, 0, 1, 1], [], []>} : vector<64x32xf32>, vector<32x8xf32>, vector<64x8xf32> -> vector<64x8xf32>
    %c1_48 = arith.constant 1 : index
    %c0_49 = arith.constant 0 : index
    %c0_50 = arith.constant 0 : index
    %58 = vector.load %arg4[%c1_48, %c0_49, %c0_50] : memref<4x1x8xf32, #tpu.memory_space<vmem>>, vector<1x1x8xf32>
    %59 = vector.shape_cast %58 : vector<1x1x8xf32> to vector<1x8xf32>
    %60 = vector.broadcast %59 : vector<1x8xf32> to vector<64x8xf32>
    %61 = arith.addf %57, %60 : vector<64x8xf32>
    %62 = vector.shape_cast %61 : vector<64x8xf32> to vector<8x8x8xf32>
    %cst_51 = arith.constant dense<0.000000e+00> : vector<64x8xf32>
    %63 = tpu.matmul %3, %52, %cst_51 {dimension_numbers = #tpu.dot_dimension_numbers<[1], [0], [0], [1], [0, 0, 1, 1], [], []>} : vector<64x32xf32>, vector<32x8xf32>, vector<64x8xf32> -> vector<64x8xf32>
    %c1_52 = arith.constant 1 : index
    %c0_53 = arith.constant 0 : index
    %c0_54 = arith.constant 0 : index
    %64 = vector.load %arg6[%c1_52, %c0_53, %c0_54] : memref<4x1x8xf32, #tpu.memory_space<vmem>>, vector<1x1x8xf32>
    %65 = vector.shape_cast %64 : vector<1x1x8xf32> to vector<1x8xf32>
    %66 = vector.broadcast %65 : vector<1x8xf32> to vector<64x8xf32>
    %67 = arith.addf %63, %66 : vector<64x8xf32>
    %68 = vector.shape_cast %67 : vector<64x8xf32> to vector<8x8x8xf32>
    %cst_55 = arith.constant dense<0.000000e+00> : vector<64x8xf32>
    %69 = tpu.matmul %3, %54, %cst_55 {dimension_numbers = #tpu.dot_dimension_numbers<[1], [0], [0], [1], [0, 0, 1, 1], [], []>} : vector<64x32xf32>, vector<32x8xf32>, vector<64x8xf32> -> vector<64x8xf32>
    %c1_56 = arith.constant 1 : index
    %c0_57 = arith.constant 0 : index
    %c0_58 = arith.constant 0 : index
    %70 = vector.load %arg8[%c1_56, %c0_57, %c0_58] : memref<4x1x8xf32, #tpu.memory_space<vmem>>, vector<1x1x8xf32>
    %71 = vector.shape_cast %70 : vector<1x1x8xf32> to vector<1x8xf32>
    %72 = vector.broadcast %71 : vector<1x8xf32> to vector<64x8xf32>
    %73 = arith.addf %69, %72 : vector<64x8xf32>
    %74 = vector.shape_cast %73 : vector<64x8xf32> to vector<8x8x8xf32>
    "tpu.trace_start"() <{level = 10 : i32, message = "bqd,bkd->bqk"}> : () -> ()
    %cst_59 = arith.constant dense<0.000000e+00> : vector<8x8x8xf32>
    %75 = tpu.matmul %62, %68, %cst_59 {dimension_numbers = #tpu.dot_dimension_numbers<[2], [2], [1], [1], [0, 0, 0, 1, 1, 1], [0], [0]>} : vector<8x8x8xf32>, vector<8x8x8xf32>, vector<8x8x8xf32> -> vector<8x8x8xf32>
    "tpu.trace_stop"() : () -> ()
    %cst_60 = arith.constant dense<0xFF800000> : vector<8x8xf32>
    %76 = vector.multi_reduction <maximumf>, %75, %cst_60 [2] : vector<8x8x8xf32> to vector<8x8xf32>
    %77 = vector.shape_cast %76 : vector<8x8xf32> to vector<8x8x1xf32>
    %78 = vector.broadcast %77 : vector<8x8x1xf32> to vector<8x8x8xf32>
    %79 = arith.subf %75, %78 : vector<8x8x8xf32>
    %80 = math.exp %79 : vector<8x8x8xf32>
    %cst_61 = arith.constant dense<0.000000e+00> : vector<8x8xf32>
    %81 = vector.multi_reduction <add>, %80, %cst_61 [2] : vector<8x8x8xf32> to vector<8x8xf32>
    %82 = vector.shape_cast %81 : vector<8x8xf32> to vector<8x8x1xf32>
    %83 = tpu.reciprocal %82 {approx = true} : vector<8x8x1xf32> -> vector<8x8x1xf32>
    %84 = vector.broadcast %83 : vector<8x8x1xf32> to vector<8x8x8xf32>
    %85 = arith.mulf %80, %84 : vector<8x8x8xf32>
    "tpu.trace_start"() <{level = 10 : i32, message = "bqk,bkd->bqd"}> : () -> ()
    %cst_62 = arith.constant dense<0.000000e+00> : vector<8x8x8xf32>
    %86 = tpu.matmul %85, %74, %cst_62 {dimension_numbers = #tpu.dot_dimension_numbers<[2], [1], [1], [2], [0, 0, 0, 1, 1, 2], [0], [0]>} : vector<8x8x8xf32>, vector<8x8x8xf32>, vector<8x8x8xf32> -> vector<8x8x8xf32>
    "tpu.trace_stop"() : () -> ()
    %87 = vector.shape_cast %86 : vector<8x8x8xf32> to vector<64x8xf32>
    %cst_63 = arith.constant dense<0.000000e+00> : vector<64x32xf32>
    %88 = tpu.matmul %87, %56, %cst_63 {dimension_numbers = #tpu.dot_dimension_numbers<[1], [0], [0], [1], [0, 0, 1, 1], [], []>} : vector<64x8xf32>, vector<8x32xf32>, vector<64x32xf32> -> vector<64x32xf32>
    %89 = arith.addf %48, %88 : vector<64x32xf32>
    %c2 = arith.constant 2 : index
    %c0_64 = arith.constant 0 : index
    %c0_65 = arith.constant 0 : index
    %90 = vector.load %arg3[%c2, %c0_64, %c0_65] : memref<4x32x8xf32, #tpu.memory_space<vmem>>, vector<1x32x8xf32>
    %91 = vector.shape_cast %90 : vector<1x32x8xf32> to vector<32x8xf32>
    %c2_66 = arith.constant 2 : index
    %c0_67 = arith.constant 0 : index
    %c0_68 = arith.constant 0 : index
    %92 = vector.load %arg5[%c2_66, %c0_67, %c0_68] : memref<4x32x8xf32, #tpu.memory_space<vmem>>, vector<1x32x8xf32>
    %93 = vector.shape_cast %92 : vector<1x32x8xf32> to vector<32x8xf32>
    %c2_69 = arith.constant 2 : index
    %c0_70 = arith.constant 0 : index
    %c0_71 = arith.constant 0 : index
    %94 = vector.load %arg7[%c2_69, %c0_70, %c0_71] : memref<4x32x8xf32, #tpu.memory_space<vmem>>, vector<1x32x8xf32>
    %95 = vector.shape_cast %94 : vector<1x32x8xf32> to vector<32x8xf32>
    %c2_72 = arith.constant 2 : index
    %c0_73 = arith.constant 0 : index
    %c0_74 = arith.constant 0 : index
    %96 = vector.load %arg9[%c2_72, %c0_73, %c0_74] : memref<4x8x32xf32, #tpu.memory_space<vmem>>, vector<1x8x32xf32>
    %97 = vector.shape_cast %96 : vector<1x8x32xf32> to vector<8x32xf32>
    %cst_75 = arith.constant dense<0.000000e+00> : vector<64x8xf32>
    %98 = tpu.matmul %2, %91, %cst_75 {dimension_numbers = #tpu.dot_dimension_numbers<[1], [0], [0], [1], [0, 0, 1, 1], [], []>} : vector<64x32xf32>, vector<32x8xf32>, vector<64x8xf32> -> vector<64x8xf32>
    %c2_76 = arith.constant 2 : index
    %c0_77 = arith.constant 0 : index
    %c0_78 = arith.constant 0 : index
    %99 = vector.load %arg4[%c2_76, %c0_77, %c0_78] : memref<4x1x8xf32, #tpu.memory_space<vmem>>, vector<1x1x8xf32>
    %100 = vector.shape_cast %99 : vector<1x1x8xf32> to vector<1x8xf32>
    %101 = vector.broadcast %100 : vector<1x8xf32> to vector<64x8xf32>
    %102 = arith.addf %98, %101 : vector<64x8xf32>
    %103 = vector.shape_cast %102 : vector<64x8xf32> to vector<8x8x8xf32>
    %cst_79 = arith.constant dense<0.000000e+00> : vector<64x8xf32>
    %104 = tpu.matmul %3, %93, %cst_79 {dimension_numbers = #tpu.dot_dimension_numbers<[1], [0], [0], [1], [0, 0, 1, 1], [], []>} : vector<64x32xf32>, vector<32x8xf32>, vector<64x8xf32> -> vector<64x8xf32>
    %c2_80 = arith.constant 2 : index
    %c0_81 = arith.constant 0 : index
    %c0_82 = arith.constant 0 : index
    %105 = vector.load %arg6[%c2_80, %c0_81, %c0_82] : memref<4x1x8xf32, #tpu.memory_space<vmem>>, vector<1x1x8xf32>
    %106 = vector.shape_cast %105 : vector<1x1x8xf32> to vector<1x8xf32>
    %107 = vector.broadcast %106 : vector<1x8xf32> to vector<64x8xf32>
    %108 = arith.addf %104, %107 : vector<64x8xf32>
    %109 = vector.shape_cast %108 : vector<64x8xf32> to vector<8x8x8xf32>
    %cst_83 = arith.constant dense<0.000000e+00> : vector<64x8xf32>
    %110 = tpu.matmul %3, %95, %cst_83 {dimension_numbers = #tpu.dot_dimension_numbers<[1], [0], [0], [1], [0, 0, 1, 1], [], []>} : vector<64x32xf32>, vector<32x8xf32>, vector<64x8xf32> -> vector<64x8xf32>
    %c2_84 = arith.constant 2 : index
    %c0_85 = arith.constant 0 : index
    %c0_86 = arith.constant 0 : index
    %111 = vector.load %arg8[%c2_84, %c0_85, %c0_86] : memref<4x1x8xf32, #tpu.memory_space<vmem>>, vector<1x1x8xf32>
    %112 = vector.shape_cast %111 : vector<1x1x8xf32> to vector<1x8xf32>
    %113 = vector.broadcast %112 : vector<1x8xf32> to vector<64x8xf32>
    %114 = arith.addf %110, %113 : vector<64x8xf32>
    %115 = vector.shape_cast %114 : vector<64x8xf32> to vector<8x8x8xf32>
    "tpu.trace_start"() <{level = 10 : i32, message = "bqd,bkd->bqk"}> : () -> ()
    %cst_87 = arith.constant dense<0.000000e+00> : vector<8x8x8xf32>
    %116 = tpu.matmul %103, %109, %cst_87 {dimension_numbers = #tpu.dot_dimension_numbers<[2], [2], [1], [1], [0, 0, 0, 1, 1, 1], [0], [0]>} : vector<8x8x8xf32>, vector<8x8x8xf32>, vector<8x8x8xf32> -> vector<8x8x8xf32>
    "tpu.trace_stop"() : () -> ()
    %cst_88 = arith.constant dense<0xFF800000> : vector<8x8xf32>
    %117 = vector.multi_reduction <maximumf>, %116, %cst_88 [2] : vector<8x8x8xf32> to vector<8x8xf32>
    %118 = vector.shape_cast %117 : vector<8x8xf32> to vector<8x8x1xf32>
    %119 = vector.broadcast %118 : vector<8x8x1xf32> to vector<8x8x8xf32>
    %120 = arith.subf %116, %119 : vector<8x8x8xf32>
    %121 = math.exp %120 : vector<8x8x8xf32>
    %cst_89 = arith.constant dense<0.000000e+00> : vector<8x8xf32>
    %122 = vector.multi_reduction <add>, %121, %cst_89 [2] : vector<8x8x8xf32> to vector<8x8xf32>
    %123 = vector.shape_cast %122 : vector<8x8xf32> to vector<8x8x1xf32>
    %124 = tpu.reciprocal %123 {approx = true} : vector<8x8x1xf32> -> vector<8x8x1xf32>
    %125 = vector.broadcast %124 : vector<8x8x1xf32> to vector<8x8x8xf32>
    %126 = arith.mulf %121, %125 : vector<8x8x8xf32>
    "tpu.trace_start"() <{level = 10 : i32, message = "bqk,bkd->bqd"}> : () -> ()
    %cst_90 = arith.constant dense<0.000000e+00> : vector<8x8x8xf32>
    %127 = tpu.matmul %126, %115, %cst_90 {dimension_numbers = #tpu.dot_dimension_numbers<[2], [1], [1], [2], [0, 0, 0, 1, 1, 2], [0], [0]>} : vector<8x8x8xf32>, vector<8x8x8xf32>, vector<8x8x8xf32> -> vector<8x8x8xf32>
    "tpu.trace_stop"() : () -> ()
    %128 = vector.shape_cast %127 : vector<8x8x8xf32> to vector<64x8xf32>
    %cst_91 = arith.constant dense<0.000000e+00> : vector<64x32xf32>
    %129 = tpu.matmul %128, %97, %cst_91 {dimension_numbers = #tpu.dot_dimension_numbers<[1], [0], [0], [1], [0, 0, 1, 1], [], []>} : vector<64x8xf32>, vector<8x32xf32>, vector<64x32xf32> -> vector<64x32xf32>
    %130 = arith.addf %89, %129 : vector<64x32xf32>
    %c3 = arith.constant 3 : index
    %c0_92 = arith.constant 0 : index
    %c0_93 = arith.constant 0 : index
    %131 = vector.load %arg3[%c3, %c0_92, %c0_93] : memref<4x32x8xf32, #tpu.memory_space<vmem>>, vector<1x32x8xf32>
    %132 = vector.shape_cast %131 : vector<1x32x8xf32> to vector<32x8xf32>
    %c3_94 = arith.constant 3 : index
    %c0_95 = arith.constant 0 : index
    %c0_96 = arith.constant 0 : index
    %133 = vector.load %arg5[%c3_94, %c0_95, %c0_96] : memref<4x32x8xf32, #tpu.memory_space<vmem>>, vector<1x32x8xf32>
    %134 = vector.shape_cast %133 : vector<1x32x8xf32> to vector<32x8xf32>
    %c3_97 = arith.constant 3 : index
    %c0_98 = arith.constant 0 : index
    %c0_99 = arith.constant 0 : index
    %135 = vector.load %arg7[%c3_97, %c0_98, %c0_99] : memref<4x32x8xf32, #tpu.memory_space<vmem>>, vector<1x32x8xf32>
    %136 = vector.shape_cast %135 : vector<1x32x8xf32> to vector<32x8xf32>
    %c3_100 = arith.constant 3 : index
    %c0_101 = arith.constant 0 : index
    %c0_102 = arith.constant 0 : index
    %137 = vector.load %arg9[%c3_100, %c0_101, %c0_102] : memref<4x8x32xf32, #tpu.memory_space<vmem>>, vector<1x8x32xf32>
    %138 = vector.shape_cast %137 : vector<1x8x32xf32> to vector<8x32xf32>
    %cst_103 = arith.constant dense<0.000000e+00> : vector<64x8xf32>
    %139 = tpu.matmul %2, %132, %cst_103 {dimension_numbers = #tpu.dot_dimension_numbers<[1], [0], [0], [1], [0, 0, 1, 1], [], []>} : vector<64x32xf32>, vector<32x8xf32>, vector<64x8xf32> -> vector<64x8xf32>
    %c3_104 = arith.constant 3 : index
    %c0_105 = arith.constant 0 : index
    %c0_106 = arith.constant 0 : index
    %140 = vector.load %arg4[%c3_104, %c0_105, %c0_106] : memref<4x1x8xf32, #tpu.memory_space<vmem>>, vector<1x1x8xf32>
    %141 = vector.shape_cast %140 : vector<1x1x8xf32> to vector<1x8xf32>
    %142 = vector.broadcast %141 : vector<1x8xf32> to vector<64x8xf32>
    %143 = arith.addf %139, %142 : vector<64x8xf32>
    %144 = vector.shape_cast %143 : vector<64x8xf32> to vector<8x8x8xf32>
    %cst_107 = arith.constant dense<0.000000e+00> : vector<64x8xf32>
    %145 = tpu.matmul %3, %134, %cst_107 {dimension_numbers = #tpu.dot_dimension_numbers<[1], [0], [0], [1], [0, 0, 1, 1], [], []>} : vector<64x32xf32>, vector<32x8xf32>, vector<64x8xf32> -> vector<64x8xf32>
    %c3_108 = arith.constant 3 : index
    %c0_109 = arith.constant 0 : index
    %c0_110 = arith.constant 0 : index
    %146 = vector.load %arg6[%c3_108, %c0_109, %c0_110] : memref<4x1x8xf32, #tpu.memory_space<vmem>>, vector<1x1x8xf32>
    %147 = vector.shape_cast %146 : vector<1x1x8xf32> to vector<1x8xf32>
    %148 = vector.broadcast %147 : vector<1x8xf32> to vector<64x8xf32>
    %149 = arith.addf %145, %148 : vector<64x8xf32>
    %150 = vector.shape_cast %149 : vector<64x8xf32> to vector<8x8x8xf32>
    %cst_111 = arith.constant dense<0.000000e+00> : vector<64x8xf32>
    %151 = tpu.matmul %3, %136, %cst_111 {dimension_numbers = #tpu.dot_dimension_numbers<[1], [0], [0], [1], [0, 0, 1, 1], [], []>} : vector<64x32xf32>, vector<32x8xf32>, vector<64x8xf32> -> vector<64x8xf32>
    %c3_112 = arith.constant 3 : index
    %c0_113 = arith.constant 0 : index
    %c0_114 = arith.constant 0 : index
    %152 = vector.load %arg8[%c3_112, %c0_113, %c0_114] : memref<4x1x8xf32, #tpu.memory_space<vmem>>, vector<1x1x8xf32>
    %153 = vector.shape_cast %152 : vector<1x1x8xf32> to vector<1x8xf32>
    %154 = vector.broadcast %153 : vector<1x8xf32> to vector<64x8xf32>
    %155 = arith.addf %151, %154 : vector<64x8xf32>
    %156 = vector.shape_cast %155 : vector<64x8xf32> to vector<8x8x8xf32>
    "tpu.trace_start"() <{level = 10 : i32, message = "bqd,bkd->bqk"}> : () -> ()
    %cst_115 = arith.constant dense<0.000000e+00> : vector<8x8x8xf32>
    %157 = tpu.matmul %144, %150, %cst_115 {dimension_numbers = #tpu.dot_dimension_numbers<[2], [2], [1], [1], [0, 0, 0, 1, 1, 1], [0], [0]>} : vector<8x8x8xf32>, vector<8x8x8xf32>, vector<8x8x8xf32> -> vector<8x8x8xf32>
    "tpu.trace_stop"() : () -> ()
    %cst_116 = arith.constant dense<0xFF800000> : vector<8x8xf32>
    %158 = vector.multi_reduction <maximumf>, %157, %cst_116 [2] : vector<8x8x8xf32> to vector<8x8xf32>
    %159 = vector.shape_cast %158 : vector<8x8xf32> to vector<8x8x1xf32>
    %160 = vector.broadcast %159 : vector<8x8x1xf32> to vector<8x8x8xf32>
    %161 = arith.subf %157, %160 : vector<8x8x8xf32>
    %162 = math.exp %161 : vector<8x8x8xf32>
    %cst_117 = arith.constant dense<0.000000e+00> : vector<8x8xf32>
    %163 = vector.multi_reduction <add>, %162, %cst_117 [2] : vector<8x8x8xf32> to vector<8x8xf32>
    %164 = vector.shape_cast %163 : vector<8x8xf32> to vector<8x8x1xf32>
    %165 = tpu.reciprocal %164 {approx = true} : vector<8x8x1xf32> -> vector<8x8x1xf32>
    %166 = vector.broadcast %165 : vector<8x8x1xf32> to vector<8x8x8xf32>
    %167 = arith.mulf %162, %166 : vector<8x8x8xf32>
    "tpu.trace_start"() <{level = 10 : i32, message = "bqk,bkd->bqd"}> : () -> ()
    %cst_118 = arith.constant dense<0.000000e+00> : vector<8x8x8xf32>
    %168 = tpu.matmul %167, %156, %cst_118 {dimension_numbers = #tpu.dot_dimension_numbers<[2], [1], [1], [2], [0, 0, 0, 1, 1, 2], [0], [0]>} : vector<8x8x8xf32>, vector<8x8x8xf32>, vector<8x8x8xf32> -> vector<8x8x8xf32>
    "tpu.trace_stop"() : () -> ()
    %169 = vector.shape_cast %168 : vector<8x8x8xf32> to vector<64x8xf32>
    %cst_119 = arith.constant dense<0.000000e+00> : vector<64x32xf32>
    %170 = tpu.matmul %169, %138, %cst_119 {dimension_numbers = #tpu.dot_dimension_numbers<[1], [0], [0], [1], [0, 0, 1, 1], [], []>} : vector<64x8xf32>, vector<8x32xf32>, vector<64x32xf32> -> vector<64x32xf32>
    %171 = arith.addf %130, %170 : vector<64x32xf32>
    %172 = vector.shape_cast %171 : vector<64x32xf32> to vector<8x8x32xf32>
    %c0_120 = arith.constant 0 : index
    %c0_121 = arith.constant 0 : index
    %c0_122 = arith.constant 0 : index
    %173 = vector.load %arg11[%c0_120, %c0_121, %c0_122] : memref<8x8x32xf32, #tpu.memory_space<vmem>>, vector<8x8x32xf32>
    tpu.vector_store %arg11[%c0_120, %c0_121, %c0_122], %172 {strides = array<i32>} : memref<8x8x32xf32, #tpu.memory_space<vmem>>, vector<8x8x32xf32>,
    return
  }
  func.func @transform_0(%arg0: i32) -> (i32, i32, i32) {
    %c0_i32 = arith.constant 0 : i32
    %c0_i32_0 = arith.constant 0 : i32
    %c0_i32_1 = arith.constant 0 : i32
    return %arg0, %c0_i32, %c0_i32_0 : i32, i32, i32
  }
  func.func @transform_1(%arg0: i32) -> (i32, i32, i32) {
    %c0_i32 = arith.constant 0 : i32
    %c0_i32_0 = arith.constant 0 : i32
    %c0_i32_1 = arith.constant 0 : i32
    return %arg0, %c0_i32, %c0_i32_0 : i32, i32, i32
  }
  func.func @transform_2(%arg0: i32) -> (i32, i32, i32) {
    %c0_i32 = arith.constant 0 : i32
    %c0_i32_0 = arith.constant 0 : i32
    %c0_i32_1 = arith.constant 0 : i32
    %c0_i32_2 = arith.constant 0 : i32
    return %c0_i32, %c0_i32_0, %c0_i32_1 : i32, i32, i32
  }
  func.func @transform_3(%arg0: i32) -> (i32, i32, i32) {
    %c0_i32 = arith.constant 0 : i32
    %c0_i32_0 = arith.constant 0 : i32
    %c0_i32_1 = arith.constant 0 : i32
    %c0_i32_2 = arith.constant 0 : i32
    return %c0_i32, %c0_i32_0, %c0_i32_1 : i32, i32, i32
  }
  func.func @transform_4(%arg0: i32) -> (i32, i32, i32) {
    %c0_i32 = arith.constant 0 : i32
    %c0_i32_0 = arith.constant 0 : i32
    %c0_i32_1 = arith.constant 0 : i32
    %c0_i32_2 = arith.constant 0 : i32
    return %c0_i32, %c0_i32_0, %c0_i32_1 : i32, i32, i32
  }
  func.func @transform_5(%arg0: i32) -> (i32, i32, i32) {
    %c0_i32 = arith.constant 0 : i32
    %c0_i32_0 = arith.constant 0 : i32
    %c0_i32_1 = arith.constant 0 : i32
    %c0_i32_2 = arith.constant 0 : i32
    return %c0_i32, %c0_i32_0, %c0_i32_1 : i32, i32, i32
  }
  func.func @transform_6(%arg0: i32) -> (i32, i32, i32) {
    %c0_i32 = arith.constant 0 : i32
    %c0_i32_0 = arith.constant 0 : i32
    %c0_i32_1 = arith.constant 0 : i32
    %c0_i32_2 = arith.constant 0 : i32
    return %c0_i32, %c0_i32_0, %c0_i32_1 : i32, i32, i32
  }
  func.func @transform_7(%arg0: i32) -> (i32, i32, i32) {
    %c0_i32 = arith.constant 0 : i32
    %c0_i32_0 = arith.constant 0 : i32
    %c0_i32_1 = arith.constant 0 : i32
    %c0_i32_2 = arith.constant 0 : i32
    return %c0_i32, %c0_i32_0, %c0_i32_1 : i32, i32, i32
  }
  func.func @transform_8(%arg0: i32) -> (i32, i32, i32) {
    %c0_i32 = arith.constant 0 : i32
    %c0_i32_0 = arith.constant 0 : i32
    %c0_i32_1 = arith.constant 0 : i32
    %c0_i32_2 = arith.constant 0 : i32
    return %c0_i32, %c0_i32_0, %c0_i32_1 : i32, i32, i32
  }
  func.func @transform_9(%arg0: i32) -> (i32, i32) {
    %c0_i32 = arith.constant 0 : i32
    %c0_i32_0 = arith.constant 0 : i32
    %c0_i32_1 = arith.constant 0 : i32
    return %c0_i32, %c0_i32_0 : i32, i32
  }
  func.func @transform_10(%arg0: i32) -> (i32, i32, i32) {
    %c0_i32 = arith.constant 0 : i32
    %c0_i32_0 = arith.constant 0 : i32
    %c0_i32_1 = arith.constant 0 : i32
    return %arg0, %c0_i32, %c0_i32_0 : i32, i32, i32
  }
}

</mosaic_0001>

<bundles_post_ra>
// kernel: tpu_custom_call.1
= control target key start
LH: loop header
LB: loop body
LE: loop exit
PB: predicated region body
PF: predicated region fallthrough
CT: control target
= control target key end

     0   :  { %vm80_vm0 = vcmask 261120   ;;  %s9870_s0 = inlined_call_operand.vmem [shape: f32[8,8,32], index: 0, kind: input, shape index: {}]   ;;  %s9871_s1 = inlined_call_operand.vmem [shape: f32[8,8,32], index: 1, kind: input, shape index: {}]   ;;  %s9872_s2 = inlined_call_operand.vmem [shape: f32[4,32,8], index: 2, kind: input, shape index: {}]   ;;  %s9873_s3 = inlined_call_operand.vmem [shape: f32[4,1,8], index: 3, kind: input, shape index: {}]   ;;  %s9874_s4 = inlined_call_operand.vmem [shape: f32[4,32,8], index: 4, kind: input, shape index: {}]   ;;  %s9875_s5 = inlined_call_operand.vmem [shape: f32[4,1,8], index: 5, kind: input, shape index: {}]   ;;  %s9876_s6 = inlined_call_operand.vmem [shape: f32[4,32,8], index: 6, kind: input, shape index: {}]   ;;  %s9877_s7 = inlined_call_operand.vmem [shape: f32[4,1,8], index: 7, kind: input, shape index: {}]   ;;  %s9878_s8 = inlined_call_operand.vmem [shape: f32[4,8,32], index: 8, kind: input, shape index: {}]   ;;  %s9879_s9 = inlined_call_operand.vmem [shape: f32[1,32], index: 9, kind: input, shape index: {}]   ;;  %s9880_s10 = inlined_call_operand.hbm [shape: f32[8,8,32], index: 10, kind: output, shape index: {}]  }
   0x1   :  { %v60_v0 = vld [vmem:[%s9872_s2] sm:$0xff]  ;;  %v61_v1 = vld [vmem:[%s9872_s2 + $0x8] sm:$0xff]  ;;  %v62_v2 = vld [vmem:[%s9872_s2 + $0x10] sm:$0xff] }
   0x2   :  { %v8428_v3 = vpack.c.bf16 %v61_v1, %v60_v0  ;;  %v63_v4 = vld [vmem:[%s9872_s2 + $0x18] sm:$0xff]  ;;  %v8808_v5 = vld [vmem:[%s9870_s0 + $0x20] sm:$0xff]  ;;  %v65_v8 = vld [vmem:[%s9874_s4 + $0x8] sm:$0xff] }
   0x3   :  { %v8432_v6 = vpack.c.bf16 %v63_v4, %v62_v2  ;;  %7826 = vmatprep.mubr.msk.f32.mxu1 %vm80_vm0, %v8808_v5  ;;  %v64_v7 = vld [vmem:[%s9874_s4] sm:$0xff]  ;;  %v66_v11 = vld [vmem:[%s9874_s4 + $0x10] sm:$0xff]  ;;  %v67_v12 = vld [vmem:[%s9874_s4 + $0x18] sm:$0xff] }
   0x4   :  { %8524 = vmatprep.subr.bf16.mxu1 %v8428_v3  ;;  %8429 = vmatprep.subr.bf16.mxu0 %v8428_v3  ;;  %v8821_v9 = vld [vmem:[%s9870_s0] sm:$0xff]  ;;  %v8436_v10 = vpack.c.bf16 %v65_v8, %v64_v7  ;;  %v8834_v13 = vld [vmem:[%s9870_s0 + $0x28] sm:$0xff]  ;;  %v8850_v17 = vld [vmem:[%s9870_s0 + $0x30] sm:$0xff]  ;;  %v8440_v18 = vpack.c.bf16 %v67_v12, %v66_v11 }
   0x5   :  { %8526 = vmatpush3.bf16.msra.mxu1 %v8428_v3  ;;  %8431 = vmatpush3.bf16.msra.mxu0 %v8428_v3  ;;  %v8839_v14 = vld [vmem:[%s9870_s0 + $0x8] sm:$0xff]  ;;  %v68_v15 = vld [vmem:[%s9876_s6] sm:$0xff] }
   0x6   :  { %8525 = vmatprep.subr.bf16.mxu1 %v8432_v6  ;;  %8433 = vmatprep.subr.bf16.mxu0 %v8432_v6  ;;  %v69_v16 = vld [vmem:[%s9876_s6 + $0x8] sm:$0xff] }
   0x7   :  { %7820 = vmatprep.mubr.msk.f32.mxu0 %vm80_vm0, %v8821_v9 }
   0x9   :  { %8527 = vmatpush3.bf16.msra.mxu1 %v8432_v6  ;;  %8435 = vmatpush3.bf16.msra.mxu0 %v8432_v6 }
   0xa   :  { %8437 = vmatprep.subr.bf16.mxu1 %v8436_v10 }
   0xb   :  { %15 = vsyncpa [#allocation3], 0  ;;  %v8855_v19 = vld [vmem:[%s9870_s0 + $0x10] sm:$0xff]  ;;  %v8444_v20 = vpack.c.bf16 %v69_v16, %v68_v15  ;;  %v8866_v21 = vld [vmem:[%s9870_s0 + $0x38] sm:$0xff]  ;;  %v8733_v34 = vmov 0.0   ;;  %vm8734_vm1 = vmmov 0  }
   0xc   :  { %7827 = vmatmul.mubr.msk.f32.vlgmr.msra.gmra.mrb[0].mxu1 %vm80_vm0, %v8834_v13  ;;  %7821 = vmatmul.mubr.msk.f32.vlgmr.msra.gmra.mrb[0].mxu0 %vm80_vm0, %v8839_v14  ;;  %v8871_v22 = vld [vmem:[%s9870_s0 + $0x18] sm:$0xff]  ;;  %v8876_v23 = vld [vmem:[%s9871_s1] sm:$0xff]  ;;  %v8889_v24 = vld [vmem:[%s9871_s1 + $0x8] sm:$0xff]  ;;  %vm458_vm2 = vcmask 64512  }
   0xd   :  { %8439 = vmatpush3.bf16.msra.mxu1 %v8436_v10  ;;  %7829 = vmatprep.mubr.msk.f32.mxu1 %vm80_vm0, %v8850_v17  ;;  %v8894_v25 = vld [vmem:[%s9871_s1 + $0x10] sm:$0xff]  ;;  %v8905_v26 = vld [vmem:[%s9871_s1 + $0x18] sm:$0xff]  ;;  %v8910_v27 = vld [vmem:[%s9871_s1 + $0x20] sm:$0xff] }
   0xe   :  { %8441 = vmatprep.subr.bf16.mxu1 %v8440_v18  ;;  %7823 = vmatprep.mubr.msk.f32.mxu0 %vm80_vm0, %v8855_v19  ;;  %v8919_v28 = vld [vmem:[%s9871_s1 + $0x28] sm:$0xff]  ;;  %v8924_v29 = vld [vmem:[%s9871_s1 + $0x30] sm:$0xff]  ;;  %v8933_v30 = vld [vmem:[%s9871_s1 + $0x38] sm:$0xff] }
   0xf   :  { %8445 = vmatprep.subr.bf16.mxu0 %v8444_v20  ;;  %v70_v31 = vld [vmem:[%s9876_s6 + $0x10] sm:$0xff]  ;;  %v71_v32 = vld [vmem:[%s9876_s6 + $0x18] sm:$0xff]  ;;  %v7229_v43 = vld [vmem:[%s9875_s5] ss:$0 sm:$0xff] }
  0x10   :  { %7830 = vmatmul.mubr.msk.f32.gmra.mrb[2].mxu1 %vm80_vm0, %v8866_v21  ;;  %7824 = vmatmul.mubr.msk.f32.gmra.mrb[2].mxu0 %vm80_vm0, %v8871_v22  ;;  %v8448_v33 = vpack.c.bf16 %v71_v32, %v70_v31  ;;  %v7220_v46 = vld [vmem:[%s9873_s3] ss:$0 sm:$0xff] }
  0x11   :  { %8443 = vmatpush3.bf16.msra.mxu1 %v8440_v18  ;;  %7840 = vmatprep.mubr.msk.f32.mxu1 %vm80_vm0, %v8876_v23  ;;  %v7238_v6 = vld [vmem:[%s9877_s7] ss:$0 sm:$0xff] }
  0x12   :  { %8447 = vmatpush3.bf16.msra.mxu0 %v8444_v20  ;;  %7860 = vmatprep.mubr.msk.f32.mxu0 %vm80_vm0, %v8876_v23 }
  0x13   :  { %8449 = vmatprep.subr.bf16.mxu0 %v8448_v33  ;;  %7872 = vmatprep.subr.mxu1 %v8733_v34 }
  0x14   :  { %7841 = vmatmul.mubr.msk.f32.vlgmr.msra.gmra.mrb[4].mxu1 %vm80_vm0, %v8889_v24 }
  0x15   :  { %7843 = vmatprep.mubr.msk.f32.mxu1 %vm80_vm0, %v8894_v25 }
  0x16   :  { %8451 = vmatpush3.bf16.msra.mxu0 %v8448_v33 }
  0x17   :  { %7892 = vmatprep.subr.mxu0 %v8733_v34 }
  0x18   :  { %7844 = vmatmul.mubr.msk.f32.gmra.mrb[6].mxu1 %vm80_vm0, %v8905_v26 }
  0x19   :  { %7846 = vmatprep.mubr.msk.f32.mxu1 %vm80_vm0, %v8910_v27  ;;  %7861 = vmatmul.mubr.msk.f32.vlgmr.msra.gmra.mrb[4].mxu0 %vm80_vm0, %v8889_v24 }
  0x1a   :  { %7863 = vmatprep.mubr.msk.f32.mxu0 %vm80_vm0, %v8894_v25 }
  0x1c   :  { %7847 = vmatmul.mubr.msk.f32.gmra.mrb[8].mxu1 %vm80_vm0, %v8919_v28 }
  0x1d   :  { %7849 = vmatprep.mubr.msk.f32.mxu1 %vm80_vm0, %v8924_v29  ;;  %7864 = vmatmul.mubr.msk.f32.gmra.mrb[6].mxu0 %vm80_vm0, %v8905_v26 }
  0x1e   :  { %7866 = vmatprep.mubr.msk.f32.mxu0 %vm80_vm0, %v8910_v27 }
  0x20   :  { %7850 = vmatmul.mubr.msk.f32.gmra.mrb[10].mxu1 %vm80_vm0, %v8933_v30 }
  0x21   :  { %7874 = vmatprep.mubr.msk.f32.mxu1 %vm8734_vm1, %v8733_v34  ;;  %7867 = vmatmul.mubr.msk.f32.gmra.mrb[8].mxu0 %vm80_vm0, %v8919_v28 }
  0x22   :  { %7869 = vmatprep.mubr.msk.f32.mxu0 %vm80_vm0, %v8924_v29 }
  0x25   :  { %7870 = vmatmul.mubr.msk.f32.gmra.mrb[10].mxu0 %vm80_vm0, %v8933_v30 }
  0x26   :  { %7894 = vmatprep.mubr.msk.f32.mxu0 %vm8734_vm1, %v8733_v34 }
  0xdf   :  { %v7828_v35 = vpop.f32.mrb[0].mxu1  ;;  %v7822_v36 = vpop.f32.mrb[0].mxu0 }
  0xe0   :  { %v191_v37 = vpop.f32.mrb[1].mxu1  ;;  %v171_v38 = vpop.f32.mrb[1].mxu0  ;;  %v177_v54 = vadd.f32 %v7822_v36, %v7220_v46  ;;  %v197_v2 = vadd.f32 %v7828_v35, %v7220_v46 }
  0xe1   :  { %v172_v48 = vadd.f32 %v7220_v46, %v171_v38  ;;  %v192_v59 = vadd.f32 %v7220_v46, %v191_v37 }
  0xe3   :  { %v7831_v39 = vpop.f32.mrb[2].mxu1  ;;  %v7825_v40 = vpop.f32.mrb[2].mxu0 }
  0xe4   :  { %v201_v41 = vpop.f32.mrb[3].mxu1  ;;  %v181_v42 = vpop.f32.mrb[3].mxu0  ;;  %v187_v0 = vadd.f32 %v7825_v40, %v7220_v46  ;;  %v207_v4 = vadd.f32 %v7831_v39, %v7220_v46 }
  0xe5   :  { %v182_v57 = vadd.f32 %v7220_v46, %v181_v42  ;;  %v202_v63 = vadd.f32 %v7220_v46, %v201_v41 }
  0xe7   :  { %v7842_v44 = vpop.f32.mrb[4].mxu1 }
  0xe8   :  { %v307_v45 = vpop.f32.mrb[5].mxu1  ;;  %v313_v51 = vadd.f32 %v7842_v44, %v7229_v43 }
  0xe9   :  { %v308_v47 = vadd.f32 %v7229_v43, %v307_v45 }
  0xeb   :  { %7873 = vmatpush3.xpose.msk.msra.mxu1 %vm458_vm2, %v308_v47  ;;  %v7845_v49 = vpop.f32.mrb[6].mxu1 }
  0xec   :  { %v317_v50 = vpop.f32.mrb[7].mxu1  ;;  %7877 = vmatprep.subr.mxu1 %v8733_v34  ;;  %v323_v61 = vadd.f32 %v7845_v49, %v7229_v43  ;;  %v7862_v7 = vpop.f32.mrb[4].mxu0 }
  0xed   :  { %v318_v52 = vadd.f32 %v7229_v43, %v317_v50  ;;  %v425_v8 = vadd.f32 %v7862_v7, %v7238_v6  ;;  %v419_v10 = vpop.f32.mrb[5].mxu0 }
  0xee   :  { %7875 = vmatmul.mubr.msk.f32.vlgmr.msra.gmra.mrb[12].mxu1 %vm458_vm2, %v172_v48  ;;  %v420_v11 = vadd.f32 %v7238_v6, %v419_v10 }
  0xef   :  { %v7848_v53 = vpop.f32.mrb[8].mxu1  ;;  %7878 = vmatpush3.xpose.msk.msra.mxu1 %vm458_vm2, %v313_v51  ;;  %7879 = vmatprep.mubr.msk.f32.mxu1 %vm8734_vm1, %v8733_v34 }
  0xf0   :  { %v327_v55 = vpop.f32.mrb[9].mxu1  ;;  %7882 = vmatprep.subr.mxu1 %v8733_v34  ;;  %v333_v1 = vadd.f32 %v7848_v53, %v7229_v43  ;;  %v7865_v12 = vpop.f32.mrb[6].mxu0 }
  0xf1   :  { %v328_v56 = vadd.f32 %v7229_v43, %v327_v55  ;;  %v9014_v15 = vadd.f32 %v7865_v12, %v7238_v6  ;;  %v429_v16 = vpop.f32.mrb[7].mxu0 }
  0xf2   :  { %7880 = vmatmul.mubr.msk.f32.vlgmr.msra.gmra.mrb[14].mxu1 %vm458_vm2, %v177_v54  ;;  %v9016_v18 = vadd.f32 %v7238_v6, %v429_v16 }
  0xf3   :  { %v7851_v58 = vpop.f32.mrb[10].mxu1  ;;  %7883 = vmatpush3.xpose.msk.msra.mxu1 %vm458_vm2, %v318_v52  ;;  %7893 = vmatpush3.xpose.msk.msra.mxu0 %vm458_vm2, %v328_v56 }
  0xf4   :  { %v337_v60 = vpop.f32.mrb[11].mxu1  ;;  %7884 = vmatprep.mubr.msk.f32.mxu1 %vm8734_vm1, %v8733_v34  ;;  %7887 = vmatprep.subr.mxu1 %v8733_v34  ;;  %v343_v3 = vadd.f32 %v7851_v58, %v7229_v43  ;;  %v7868_v20 = vpop.f32.mrb[8].mxu0 }
  0xf5   :  { %v338_v62 = vadd.f32 %v7229_v43, %v337_v60  ;;  %7902 = vmatprep.subr.mxu0 %v8733_v34  ;;  %v9018_v31 = vadd.f32 %v7868_v20, %v7238_v6  ;;  %v439_v32 = vpop.f32.mrb[9].mxu0 }
  0xf6   :  { %7885 = vmatmul.mubr.msk.f32.vlgmr.msra.gmra.mrb[16].mxu1 %vm458_vm2, %v182_v57  ;;  %7895 = vmatmul.mubr.msk.f32.vlgmr.msra.gmra.mrb[12].mxu0 %vm458_vm2, %v192_v59  ;;  %v9020_v33 = vadd.f32 %v7238_v6, %v439_v32 }
  0xf7   :  { %7888 = vmatpush3.xpose.msk.msra.mxu1 %vm458_vm2, %v323_v61  ;;  %7903 = vmatpush3.xpose.msk.msra.mxu0 %vm458_vm2, %v338_v62 }
  0xf8   :  { %7889 = vmatprep.mubr.msk.f32.mxu1 %vm8734_vm1, %v8733_v34  ;;  %7904 = vmatprep.mubr.msk.f32.mxu0 %vm8734_vm1, %v8733_v34  ;;  %v7871_v35 = vpop.f32.mrb[10].mxu0 }
  0xf9   :  { %7897 = vmatprep.subr.mxu1 %v8733_v34  ;;  %7912 = vmatprep.subr.mxu0 %v8733_v34  ;;  %v9022_v36 = vadd.f32 %v7871_v35, %v7238_v6  ;;  %v449_v37 = vpop.f32.mrb[11].mxu0 }
  0xfa   :  { %7890 = vmatmul.mubr.msk.f32.vlgmr.msra.gmra.mrb[18].mxu1 %vm458_vm2, %v187_v0  ;;  %7905 = vmatmul.mubr.msk.f32.vlgmr.msra.gmra.mrb[14].mxu0 %vm458_vm2, %v202_v63  ;;  %v9024_v38 = vadd.f32 %v7238_v6, %v449_v37 }
  0xfb   :  { %7898 = vmatpush3.xpose.msk.msra.mxu1 %vm458_vm2, %v333_v1  ;;  %7899 = vmatprep.mubr.msk.f32.mxu1 %vm8734_vm1, %v8733_v34 }
  0xfc   :  { %7907 = vmatprep.subr.mxu1 %v8733_v34  ;;  %7914 = vmatprep.mubr.msk.f32.mxu0 %vm8734_vm1, %v8733_v34 }
  0xfd   :  { %7913 = vmatpush3.msra.mxu0 %v420_v11 }
  0xfe   :  { %7900 = vmatmul.mubr.msk.f32.vlgmr.msra.gmra.mrb[20].mxu1 %vm458_vm2, %v197_v2  ;;  %7922 = vmatprep.subr.mxu0 %v8733_v34 }
  0xff   :  { %7908 = vmatpush3.xpose.msk.msra.mxu1 %vm458_vm2, %v343_v3  ;;  %7909 = vmatprep.mubr.msk.f32.mxu1 %vm8734_vm1, %v8733_v34 }
 0x100   :  { %7917 = vmatprep.subr.mxu1 %v8733_v34 }
 0x102   :  { %7910 = vmatmul.mubr.msk.f32.vlgmr.msra.gmra.mrb[22].mxu1 %vm458_vm2, %v207_v4 }
 0x103   :  { %7919 = vmatprep.mubr.msk.f32.mxu1 %vm8734_vm1, %v8733_v34  ;;  %7918 = vmatpush3.msra.mxu1 %v425_v8 }
 0x104   :  { %7927 = vmatprep.subr.mxu1 %v8733_v34 }
 0x1c1   :  { %v531_v39 = vpop.f32.mrb[12].mxu1 }
 0x1c2   :  { %v7876_v40 = vpop.f32.mrb[13].mxu1  ;;  %v1067_v41 = vsel %vm458_vm2, %v531_v39, -inf }
 0x1c3   :  { %1068 = vmax.xlane.f32.xlu0 %v1067_v41 }
 0x1c5   :  { %v607_v42 = vpop.f32.mrb[14].mxu1 }
 0x1c6   :  { %v7881_v43 = vpop.f32.mrb[15].mxu1  ;;  %v1070_v44 = vsel %vm458_vm2, %v607_v42, -inf }
 0x1c7   :  { %1071 = vmax.xlane.f32.xlu0 %v1070_v44 }
 0x1c9   :  { %v683_v45 = vpop.f32.mrb[16].mxu1  ;;  %v835_v46 = vpop.f32.mrb[12].mxu0 }
 0x1ca   :  { %v7886_v47 = vpop.f32.mrb[17].mxu1  ;;  %v7896_v48 = vpop.f32.mrb[13].mxu0  ;;  %v1079_v49 = vsel %vm458_vm2, %v835_v46, -inf  ;;  %v1073_v50 = vsel %vm458_vm2, %v683_v45, -inf }
 0x1cb   :  { %1080 = vmax.xlane.f32.xlu0 %v1079_v49  ;;  %1074 = vmax.xlane.f32.xlu1 %v1073_v50 }
 0x1cd   :  { %v759_v51 = vpop.f32.mrb[18].mxu1  ;;  %v987_v52 = vpop.f32.mrb[14].mxu0 }
 0x1ce   :  { %v7891_v53 = vpop.f32.mrb[19].mxu1  ;;  %v7906_v54 = vpop.f32.mrb[15].mxu0  ;;  %v1085_v55 = vsel %vm458_vm2, %v987_v52, -inf  ;;  %v1076_v56 = vsel %vm458_vm2, %v759_v51, -inf }
 0x1cf   :  { %1086 = vmax.xlane.f32.xlu0 %v1085_v55  ;;  %1077 = vmax.xlane.f32.xlu1 %v1076_v56 }
 0x1d1   :  { %v911_v57 = vpop.f32.mrb[20].mxu1 }
 0x1d2   :  { %v7901_v58 = vpop.f32.mrb[21].mxu1  ;;  %v1082_v59 = vsel %vm458_vm2, %v911_v57, -inf }
 0x1d3   :  { %1083 = vmax.xlane.f32.xlu1 %v1082_v59 }
 0x1d5   :  { %v1063_v60 = vpop.f32.mrb[22].mxu1 }
 0x1d6   :  { %v7911_v61 = vpop.f32.mrb[23].mxu1  ;;  %v1088_v62 = vsel %vm458_vm2, %v1063_v60, -inf }
 0x1d7   :  { %1089 = vmax.xlane.f32.xlu1 %v1088_v62 }
 0x250   :  { %v1069_v63 = vpop.xlane.xlu0 %1068 }
 0x251   :  { %v1091_v0 = vsub.f32 %v531_v39, %v1069_v63 }
 0x253   :  { %v1099_v1 = vmul.f32 1.442695, %v1091_v0 }
 0x254   :  { %v1072_v2 = vpop.xlane.xlu0 %1071 }
 0x255   :  { %8565 = vpow2.f32 %v1099_v1  ;;  %v1092_v3 = vsub.f32 %v607_v42, %v1072_v2 }
 0x257   :  { %v1101_v4 = vmul.f32 1.442695, %v1092_v3 }
 0x258   :  { %v1081_v6 = vpop.xlane.xlu0 %1080  ;;  %v1075_v7 = vpop.xlane.xlu1 %1074 }
 0x259   :  { %8567 = vpow2.f32 %v1101_v4  ;;  %v1095_v8 = vsub.f32 %v835_v46, %v1081_v6  ;;  %v1093_v10 = vsub.f32 %v683_v45, %v1075_v7 }
 0x25b   :  { %v1103_v11 = vmul.f32 1.442695, %v1093_v10  ;;  %v1107_v12 = vmul.f32 1.442695, %v1095_v8 }
 0x25c   :  { %v1087_v16 = vpop.xlane.xlu0 %1086  ;;  %v1078_v20 = vpop.xlane.xlu1 %1077 }
 0x25d   :  { %v1097_v32 = vsub.f32 %v987_v52, %v1087_v16  ;;  %v1094_v35 = vsub.f32 %v759_v51, %v1078_v20  ;;  %8569 = vpow2.f32 %v1103_v11 }
 0x25e   :  { %8571 = vpow2.f32 %v1107_v12 }
 0x25f   :  { %v8566_v37 = vpop.eup %8565  ;;  %v1105_v40 = vmul.f32 1.442695, %v1094_v35  ;;  %v1111_v39 = vmul.f32 1.442695, %v1097_v32 }
 0x260   :  { %v1084_v41 = vpop.xlane.xlu1 %1083  ;;  %v1115_v42 = vsel %vm458_vm2, %v8566_v37, 0.0 }
 0x261   :  { %v1096_v43 = vsub.f32 %v911_v57, %v1084_v41  ;;  %1116 = vadd.xlane.f32.xlu0 %v1115_v42  ;;  %8573 = vpow2.f32 %v1105_v40 }
 0x262   :  { %8575 = vpow2.f32 %v1111_v39 }
 0x263   :  { %v8568_v44 = vpop.eup %8567  ;;  %v1109_v46 = vmul.f32 1.442695, %v1096_v43  ;;  %v7279_v43 = vld [vmem:[%s9872_s2 + $0x20] sm:$0xff] }
 0x264   :  { %v1090_v45 = vpop.xlane.xlu1 %1089  ;;  %v1118_v47 = vsel %vm458_vm2, %v8568_v44, 0.0 }
 0x265   :  { %8577 = vpow2.f32 %v1109_v46  ;;  %v1098_v48 = vsub.f32 %v1063_v60, %v1090_v45  ;;  %1119 = vadd.xlane.f32.xlu1 %v1118_v47  ;;  %v7281_v46 = vld [vmem:[%s9872_s2 + $0x30] sm:$0xff]  ;;  %v7282_v45 = vld [vmem:[%s9872_s2 + $0x38] sm:$0xff] }
 0x266   :  { %v8456_v47 = vpack.c.bf16 %v7282_v45, %v7281_v46  ;;  %v9211_v45 = vld [vmem:[%s9877_s7 + $0x1] ss:$0 sm:$0xff] }
 0x267   :  { %v1113_v49 = vmul.f32 1.442695, %v1098_v48  ;;  %v8570_v50 = vpop.eup %8569  ;;  %v7287_v48 = vld [vmem:[%s9876_s6 + $0x20] sm:$0xff] }
 0x268   :  { %v1121_v51 = vsel %vm458_vm2, %v8570_v50, 0.0  ;;  %v8572_v52 = vpop.eup %8571 }
 0x269   :  { %8579 = vpow2.f32 %v1113_v49  ;;  %1122 = vadd.xlane.f32.xlu0 %v1121_v51  ;;  %v1127_v54 = vsel %vm458_vm2, %v8572_v52, 0.0  ;;  %v7286_v49 = vld [vmem:[%s9874_s4 + $0x38] sm:$0xff] }
 0x26b   :  { %v8574_v53 = vpop.eup %8573 }
 0x26c   :  { %v1124_v55 = vsel %vm458_vm2, %v8574_v53, 0.0  ;;  %v8576_v56 = vpop.eup %8575 }
 0x26d   :  { %1128 = vadd.xlane.f32.xlu0 %v1127_v54  ;;  %1125 = vadd.xlane.f32.xlu1 %v1124_v55  ;;  %v1133_v59 = vsel %vm458_vm2, %v8576_v56, 0.0 }
 0x26f   :  { %v8578_v57 = vpop.eup %8577 }
 0x270   :  { %v1130_v58 = vsel %vm458_vm2, %v8578_v57, 0.0 }
 0x271   :  { %1134 = vadd.xlane.f32.xlu0 %v1133_v59  ;;  %1131 = vadd.xlane.f32.xlu1 %v1130_v58 }
 0x273   :  { %v8580_v60 = vpop.eup %8579 }
 0x274   :  { %v1136_v61 = vsel %vm458_vm2, %v8580_v60, 0.0 }
 0x275   :  { %1137 = vadd.xlane.f32.xlu1 %v1136_v61 }
 0x2ee   :  { %v1117_v62 = vpop.xlane.xlu0 %1116 }
 0x2ef   :  { %8581 = vrcp.f32 %v1117_v62 }
 0x2f2   :  { %v1120_v63 = vpop.xlane.xlu1 %1119 }
 0x2f3   :  { %8583 = vrcp.f32 %v1120_v63 }
 0x2f6   :  { %v1123_v0 = vpop.xlane.xlu0 %1122 }
 0x2f7   :  { %8585 = vrcp.f32 %v1123_v0 }
 0x2f9   :  { %v8582_v1 = vpop.eup %8581 }
 0x2fa   :  { %v1147_v2 = vmul.f32 %v8582_v1, %v8566_v37  ;;  %v1129_v3 = vpop.xlane.xlu0 %1128  ;;  %v1126_v4 = vpop.xlane.xlu1 %1125 }
 0x2fb   :  { %8587 = vrcp.f32 %v1129_v3 }
 0x2fc   :  { %7915 = vmatmul.mubr.msk.f32.vlgmr.msra.gmra.mrb[16].mxu0 %vm458_vm2, %v1147_v2  ;;  %8589 = vrcp.f32 %v1126_v4 }
 0x2fd   :  { %v8584_v6 = vpop.eup %8583  ;;  %7923 = vmatpush3.msra.mxu0 %v9016_v18  ;;  %7924 = vmatprep.mubr.msk.f32.mxu0 %vm8734_vm1, %v8733_v34 }
 0x2fe   :  { %v1148_v7 = vmul.f32 %v8584_v6, %v8568_v44  ;;  %7932 = vmatprep.subr.mxu0 %v8733_v34  ;;  %v1135_v8 = vpop.xlane.xlu0 %1134  ;;  %v1132_v10 = vpop.xlane.xlu1 %1131 }
 0x2ff   :  { %8591 = vrcp.f32 %v1135_v8 }
 0x300   :  { %7920 = vmatmul.mubr.msk.f32.vlgmr.msra.gmra.mrb[24].mxu1 %vm458_vm2, %v1148_v7  ;;  %8593 = vrcp.f32 %v1132_v10  ;;  %v7303_v10 = vld [vmem:[%s9875_s5 + $0x1] ss:$0 sm:$0xff] }
 0x301   :  { %7928 = vmatpush3.msra.mxu1 %v9014_v15  ;;  %7929 = vmatprep.mubr.msk.f32.mxu1 %vm8734_vm1, %v8733_v34  ;;  %v8586_v11 = vpop.eup %8585 }
 0x302   :  { %7937 = vmatprep.subr.mxu1 %v8733_v34  ;;  %v1149_v18 = vmul.f32 %v8586_v11, %v8570_v50  ;;  %v1138_v12 = vpop.xlane.xlu1 %1137 }
 0x303   :  { %8595 = vrcp.f32 %v1138_v12 }
 0x304   :  { %7925 = vmatmul.mubr.msk.f32.vlgmr.msra.gmra.mrb[18].mxu0 %vm458_vm2, %v1149_v18  ;;  %v7293_v18 = vld [vmem:[%s9873_s3 + $0x1] ss:$0 sm:$0xff] }
 0x305   :  { %v8588_v16 = vpop.eup %8587  ;;  %7933 = vmatpush3.msra.mxu0 %v9020_v33  ;;  %7934 = vmatprep.mubr.msk.f32.mxu0 %vm8734_vm1, %v8733_v34 }
 0x306   :  { %v8590_v20 = vpop.eup %8589  ;;  %v1151_v32 = vmul.f32 %v8588_v16, %v8572_v52  ;;  %7942 = vmatprep.subr.mxu0 %v8733_v34 }
 0x307   :  { %v1150_v15 = vmul.f32 %v8590_v20, %v8574_v53 }
 0x308   :  { %7935 = vmatmul.mubr.msk.f32.vlgmr.msra.gmra.mrb[20].mxu0 %vm458_vm2, %v1151_v32 }
 0x309   :  { %v8592_v35 = vpop.eup %8591  ;;  %7930 = vmatmul.mubr.msk.f32.vlgmr.msra.gmra.mrb[26].mxu1 %vm458_vm2, %v1150_v15  ;;  %7943 = vmatpush3.msra.mxu0 %v9024_v38  ;;  %v7283_v38 = vld [vmem:[%s9874_s4 + $0x20] sm:$0xff] }
 0x30a   :  { %v8594_v37 = vpop.eup %8593  ;;  %v1153_v40 = vmul.f32 %v8592_v35, %v8576_v56  ;;  %7938 = vmatpush3.msra.mxu1 %v9018_v31  ;;  %7939 = vmatprep.mubr.msk.f32.mxu1 %vm8734_vm1, %v8733_v34  ;;  %v72_v31 = vld [vmem:[%s9878_s8] sm:$0xff] }
 0x30b   :  { %v1152_v33 = vmul.f32 %v8594_v37, %v8578_v57  ;;  %7944 = vmatprep.mubr.msk.f32.mxu0 %vm8734_vm1, %v8733_v34  ;;  %7947 = vmatprep.subr.mxu1 %v8733_v34 }
 0x30c   :  { %7945 = vmatmul.mubr.msk.f32.vlgmr.msra.gmra.mrb[22].mxu0 %vm458_vm2, %v1153_v40  ;;  %7952 = vmatprep.subr.mxu0 %v72_v31 }
 0x30d   :  { %v8596_v39 = vpop.eup %8595  ;;  %7940 = vmatmul.mubr.msk.f32.vlgmr.msra.gmra.mrb[28].mxu1 %vm458_vm2, %v1152_v33  ;;  %7953 = vmatpush3.msra.mxu0 %v72_v31 }
 0x30e   :  { %v1154_v41 = vmul.f32 %v8596_v39, %v8580_v60  ;;  %7948 = vmatpush3.msra.mxu1 %v9022_v36  ;;  %7949 = vmatprep.mubr.msk.f32.mxu1 %vm8734_vm1, %v8733_v34  ;;  %v7284_v36 = vld [vmem:[%s9874_s4 + $0x28] sm:$0xff] }
 0x30f   :  { %v8460_v42 = vpack.c.bf16 %v7284_v36, %v7283_v38 }
 0x311   :  { %7950 = vmatmul.mubr.msk.f32.vlgmr.msra.gmra.mrb[30].mxu1 %vm458_vm2, %v1154_v41  ;;  %8461 = vmatprep.subr.bf16.mxu0 %v8460_v42 }
 0x312   :  { %7974 = vmatprep.mubr.msk.f32.mxu1 %vm80_vm0, %v8821_v9  ;;  %v7280_v9 = vld [vmem:[%s9872_s2 + $0x28] sm:$0xff] }
 0x313   :  { %v8452_v44 = vpack.c.bf16 %v7280_v9, %v7279_v43 }
 0x315   :  { %8453 = vmatprep.subr.bf16.mxu1 %v8452_v44 }
 0x316   :  { %8455 = vmatpush3.bf16.msra.mxu1 %v8452_v44 }
 0x317   :  { %8457 = vmatprep.subr.bf16.mxu1 %v8456_v47 }
 0x31a   :  { %8459 = vmatpush3.bf16.msra.mxu1 %v8456_v47 }
 0x31d   :  { %7975 = vmatmul.mubr.msk.f32.vlgmr.msra.gmra.mrb[32].mxu1 %vm80_vm0, %v8839_v14  ;;  %v7288_v14 = vld [vmem:[%s9876_s6 + $0x28] sm:$0xff] }
 0x31e   :  { %7977 = vmatprep.mubr.msk.f32.mxu1 %vm80_vm0, %v8855_v19  ;;  %v7289_v19 = vld [vmem:[%s9876_s6 + $0x30] sm:$0xff] }
 0x321   :  { %7978 = vmatmul.mubr.msk.f32.gmra.mrb[34].mxu1 %vm80_vm0, %v8871_v22  ;;  %v8468_v22 = vpack.c.bf16 %v7288_v14, %v7287_v48 }
 0x322   :  { %7980 = vmatprep.mubr.msk.f32.mxu1 %vm80_vm0, %v8808_v5  ;;  %v7290_v5 = vld [vmem:[%s9876_s6 + $0x38] sm:$0xff] }
 0x323   :  { %8469 = vmatprep.subr.bf16.mxu1 %v8468_v22 }
 0x324   :  { %8471 = vmatpush3.bf16.msra.mxu1 %v8468_v22 }
 0x325   :  { %7981 = vmatmul.mubr.msk.f32.gmra.mrb[36].mxu1 %vm80_vm0, %v8834_v13  ;;  %v8472_v13 = vpack.c.bf16 %v7290_v5, %v7289_v19 }
 0x326   :  { %7983 = vmatprep.mubr.msk.f32.mxu1 %vm80_vm0, %v8850_v17 }
 0x327   :  { %8473 = vmatprep.subr.bf16.mxu1 %v8472_v13 }
 0x328   :  { %8475 = vmatpush3.bf16.msra.mxu1 %v8472_v13 }
 0x329   :  { %7984 = vmatmul.mubr.msk.f32.gmra.mrb[38].mxu1 %vm80_vm0, %v8866_v21  ;;  %8036 = vmatprep.subr.mxu1 %v8733_v34  ;;  %v7285_v21 = vld [vmem:[%s9874_s4 + $0x30] sm:$0xff] }
 0x32a   :  { %8014 = vmatprep.mubr.msk.f32.mxu1 %vm80_vm0, %v8876_v23  ;;  %v8464_v51 = vpack.c.bf16 %v7286_v49, %v7285_v21 }
 0x32d   :  { %8015 = vmatmul.mubr.msk.f32.vlgmr.msra.gmra.mrb[40].mxu1 %vm80_vm0, %v8889_v24 }
 0x32e   :  { %8017 = vmatprep.mubr.msk.f32.mxu1 %vm80_vm0, %v8894_v25 }
 0x331   :  { %8018 = vmatmul.mubr.msk.f32.gmra.mrb[42].mxu1 %vm80_vm0, %v8905_v26 }
 0x332   :  { %8020 = vmatprep.mubr.msk.f32.mxu1 %vm80_vm0, %v8910_v27 }
 0x335   :  { %8021 = vmatmul.mubr.msk.f32.gmra.mrb[44].mxu1 %vm80_vm0, %v8919_v28 }
 0x336   :  { %8023 = vmatprep.mubr.msk.f32.mxu1 %vm80_vm0, %v8924_v29 }
 0x339   :  { %8024 = vmatmul.mubr.msk.f32.gmra.mrb[46].mxu1 %vm80_vm0, %v8933_v30 }
 0x33a   :  { %8038 = vmatprep.mubr.msk.f32.mxu1 %vm8734_vm1, %v8733_v34 }
 0x3cf   :  { %v1224_v17 = vpop.f32.mrb[16].mxu0 }
 0x3d0   :  { %v7916_v50 = vpop.f32.mrb[17].mxu0  ;;  %7954 = vmatprep.mubr.msk.f32.mxu0 %vm458_vm2, %v1224_v17 }
 0x3d3   :  { %v1297_v52 = vpop.f32.mrb[24].mxu1 }
 0x3d4   :  { %v7921_v53 = vpop.f32.mrb[25].mxu1  ;;  %7955 = vmatmul.mubr.msk.f32.vlgmr.msra.gmra.mrb[24].mxu0 %vm458_vm2, %v1297_v52 }
 0x3d5   :  { %8463 = vmatpush3.bf16.msra.mxu0 %v8460_v42 }
 0x3d6   :  { %8465 = vmatprep.subr.bf16.mxu0 %v8464_v51 }
 0x3d7   :  { %v1370_v54 = vpop.f32.mrb[18].mxu0 }
 0x3d8   :  { %v7926_v55 = vpop.f32.mrb[19].mxu0  ;;  %7957 = vmatprep.mubr.msk.f32.mxu0 %vm458_vm2, %v1370_v54 }
 0x3d9   :  { %8467 = vmatpush3.bf16.msra.mxu0 %v8464_v51 }
 0x3da   :  { %8026 = vmatprep.subr.mxu0 %v8733_v34 }
 0x3db   :  { %v1516_v56 = vpop.f32.mrb[20].mxu0 }
 0x3dc   :  { %v1443_v57 = vpop.f32.mrb[26].mxu1  ;;  %v7936_v58 = vpop.f32.mrb[21].mxu0 }
 0x3dd   :  { %v7931_v59 = vpop.f32.mrb[27].mxu1  ;;  %7958 = vmatmul.mubr.msk.f32.gmra.mrb[26].mxu0 %vm458_vm2, %v1443_v57 }
 0x3de   :  { %7960 = vmatprep.mubr.msk.f32.mxu0 %vm458_vm2, %v1516_v56 }
 0x3df   :  { %v1662_v60 = vpop.f32.mrb[22].mxu0 }
 0x3e0   :  { %v1589_v61 = vpop.f32.mrb[28].mxu1  ;;  %v7946_v62 = vpop.f32.mrb[23].mxu0 }
 0x3e1   :  { %v7941_v63 = vpop.f32.mrb[29].mxu1  ;;  %7961 = vmatmul.mubr.msk.f32.gmra.mrb[28].mxu0 %vm458_vm2, %v1589_v61 }
 0x3e2   :  { %7963 = vmatprep.mubr.msk.f32.mxu0 %vm458_vm2, %v1662_v60 }
 0x3e4   :  { %v1735_v0 = vpop.f32.mrb[30].mxu1 }
 0x3e5   :  { %v7951_v1 = vpop.f32.mrb[31].mxu1  ;;  %7964 = vmatmul.mubr.msk.f32.gmra.mrb[30].mxu0 %vm458_vm2, %v1735_v0 }
 0x3e6   :  { %7994 = vmatprep.mubr.msk.f32.mxu0 %vm80_vm0, %v8876_v23 }
 0x3e9   :  { %7995 = vmatmul.mubr.msk.f32.vlgmr.msra.gmra.mrb[32].mxu0 %vm80_vm0, %v8889_v24 }
 0x3ea   :  { %7997 = vmatprep.mubr.msk.f32.mxu0 %vm80_vm0, %v8894_v25 }
 0x3ed   :  { %7998 = vmatmul.mubr.msk.f32.gmra.mrb[34].mxu0 %vm80_vm0, %v8905_v26 }
 0x3ee   :  { %8000 = vmatprep.mubr.msk.f32.mxu0 %vm80_vm0, %v8910_v27 }
 0x3f0   :  { %v7976_v23 = vpop.f32.mrb[32].mxu1 }
 0x3f1   :  { %8001 = vmatmul.mubr.msk.f32.gmra.mrb[36].mxu0 %vm80_vm0, %v8919_v28  ;;  %v1967_v24 = vpop.f32.mrb[33].mxu1  ;;  %v1973_v39 = vadd.f32 %v7976_v23, %v7293_v18 }
 0x3f2   :  { %8003 = vmatprep.mubr.msk.f32.mxu0 %vm80_vm0, %v8924_v29  ;;  %v1968_v20 = vadd.f32 %v7293_v18, %v1967_v24 }
 0x3f4   :  { %v7979_v25 = vpop.f32.mrb[34].mxu1 }
 0x3f5   :  { %8004 = vmatmul.mubr.msk.f32.gmra.mrb[38].mxu0 %vm80_vm0, %v8933_v30  ;;  %v1977_v2 = vpop.f32.mrb[35].mxu1  ;;  %v1983_v43 = vadd.f32 %v7979_v25, %v7293_v18 }
 0x3f6   :  { %8028 = vmatprep.mubr.msk.f32.mxu0 %vm8734_vm1, %v8733_v34  ;;  %v1978_v40 = vadd.f32 %v7293_v18, %v1977_v2 }
 0x3f8   :  { %v7982_v26 = vpop.f32.mrb[36].mxu1 }
 0x3f9   :  { %v1987_v3 = vpop.f32.mrb[37].mxu1  ;;  %v1993_v48 = vadd.f32 %v7982_v26, %v7293_v18 }
 0x3fa   :  { %v1988_v36 = vadd.f32 %v7293_v18, %v1987_v3 }
 0x3fc   :  { %v9173_v4 = vpop.f32.mrb[38].mxu1 }
 0x3fd   :  { %v1997_v27 = vpop.f32.mrb[39].mxu1  ;;  %v2003_v5 = vadd.f32 %v9173_v4, %v7293_v18 }
 0x3fe   :  { %v1998_v47 = vadd.f32 %v7293_v18, %v1997_v27 }
 0x400   :  { %v8016_v6 = vpop.f32.mrb[40].mxu1 }
 0x401   :  { %v2193_v28 = vpop.f32.mrb[41].mxu1  ;;  %v2199_v22 = vadd.f32 %v8016_v6, %v9211_v45 }
 0x402   :  { %v2194_v14 = vadd.f32 %v9211_v45, %v2193_v28 }
 0x404   :  { %v9175_v7 = vpop.f32.mrb[42].mxu1 }
 0x405   :  { %v9177_v29 = vpop.f32.mrb[43].mxu1 }
 0x408   :  { %v9179_v8 = vpop.f32.mrb[44].mxu1 }
 0x409   :  { %v9181_v30 = vpop.f32.mrb[45].mxu1 }
 0x40c   :  { %v9239_v13 = vpop.f32.mrb[46].mxu1 }
 0x40d   :  { %v9241_v17 = vpop.f32.mrb[47].mxu1 }
 0x4bc   :  { %v7996_v11 = vpop.f32.mrb[32].mxu0 }
 0x4bd   :  { %v2080_v12 = vpop.f32.mrb[33].mxu0  ;;  %v2086_v35 = vadd.f32 %v7996_v11, %v7303_v10 }
 0x4be   :  { %v2081_v16 = vadd.f32 %v7303_v10, %v2080_v12 }
 0x4c0   :  { %v7999_v32 = vpop.f32.mrb[34].mxu0  ;;  %8027 = vmatpush3.xpose.msk.msra.mxu0 %vm458_vm2, %v2081_v16 }
 0x4c1   :  { %v2090_v15 = vpop.f32.mrb[35].mxu0  ;;  %8031 = vmatprep.subr.mxu0 %v8733_v34  ;;  %v2096_v31 = vadd.f32 %v7999_v32, %v7303_v10 }
 0x4c2   :  { %v2091_v37 = vadd.f32 %v7303_v10, %v2090_v15 }
 0x4c3   :  { %8029 = vmatmul.mubr.msk.f32.vlgmr.msra.gmra.mrb[40].mxu0 %vm458_vm2, %v1968_v20 }
 0x4c4   :  { %v8002_v33 = vpop.f32.mrb[36].mxu0  ;;  %8032 = vmatpush3.xpose.msk.msra.mxu0 %vm458_vm2, %v2086_v35  ;;  %8037 = vmatpush3.xpose.msk.msra.mxu1 %vm458_vm2, %v2091_v37 }
 0x4c5   :  { %v2100_v41 = vpop.f32.mrb[37].mxu0  ;;  %8033 = vmatprep.mubr.msk.f32.mxu0 %vm8734_vm1, %v8733_v34  ;;  %8041 = vmatprep.subr.mxu0 %v8733_v34  ;;  %v2106_v44 = vadd.f32 %v8002_v33, %v7303_v10 }
 0x4c6   :  { %v2101_v38 = vadd.f32 %v7303_v10, %v2100_v41  ;;  %8046 = vmatprep.subr.mxu1 %v8733_v34 }
 0x4c7   :  { %8034 = vmatmul.mubr.msk.f32.vlgmr.msra.gmra.mrb[42].mxu0 %vm458_vm2, %v1973_v39  ;;  %8039 = vmatmul.mubr.msk.f32.vlgmr.msra.gmra.mrb[48].mxu1 %vm458_vm2, %v1978_v40 }
 0x4c8   :  { %v8005_v42 = vpop.f32.mrb[38].mxu0  ;;  %8042 = vmatpush3.xpose.msk.msra.mxu0 %vm458_vm2, %v2096_v31  ;;  %8047 = vmatpush3.xpose.msk.msra.mxu1 %vm458_vm2, %v2101_v38 }
 0x4c9   :  { %v2110_v9 = vpop.f32.mrb[39].mxu0  ;;  %8043 = vmatprep.mubr.msk.f32.mxu0 %vm8734_vm1, %v8733_v34  ;;  %8048 = vmatprep.mubr.msk.f32.mxu1 %vm8734_vm1, %v8733_v34  ;;  %v2116_v19 = vadd.f32 %v8005_v42, %v7303_v10 }
 0x4ca   :  { %v2111_v46 = vadd.f32 %v7303_v10, %v2110_v9  ;;  %8051 = vmatprep.subr.mxu0 %v8733_v34  ;;  %8056 = vmatprep.subr.mxu1 %v8733_v34 }
 0x4cb   :  { %8044 = vmatmul.mubr.msk.f32.vlgmr.msra.gmra.mrb[44].mxu0 %vm458_vm2, %v1983_v43  ;;  %8049 = vmatmul.mubr.msk.f32.vlgmr.msra.gmra.mrb[50].mxu1 %vm458_vm2, %v1988_v36 }
 0x4cc   :  { %8052 = vmatpush3.xpose.msk.msra.mxu0 %vm458_vm2, %v2106_v44  ;;  %8057 = vmatpush3.xpose.msk.msra.mxu1 %vm458_vm2, %v2111_v46 }
 0x4cd   :  { %8053 = vmatprep.mubr.msk.f32.mxu0 %vm8734_vm1, %v8733_v34  ;;  %8058 = vmatprep.mubr.msk.f32.mxu1 %vm8734_vm1, %v8733_v34 }
 0x4ce   :  { %8061 = vmatprep.subr.mxu0 %v8733_v34  ;;  %8066 = vmatprep.subr.mxu1 %v8733_v34 }
 0x4cf   :  { %8054 = vmatmul.mubr.msk.f32.vlgmr.msra.gmra.mrb[46].mxu0 %vm458_vm2, %v1993_v48  ;;  %8059 = vmatmul.mubr.msk.f32.vlgmr.msra.gmra.mrb[52].mxu1 %vm458_vm2, %v1998_v47 }
 0x4d0   :  { %8062 = vmatpush3.xpose.msk.msra.mxu0 %vm458_vm2, %v2116_v19  ;;  %8063 = vmatprep.mubr.msk.f32.mxu0 %vm8734_vm1, %v8733_v34 }
 0x4d1   :  { %8071 = vmatprep.subr.mxu0 %v8733_v34  ;;  %8067 = vmatpush3.msra.mxu1 %v2194_v14 }
 0x4d2   :  { %8068 = vmatprep.mubr.msk.f32.mxu1 %vm8734_vm1, %v8733_v34  ;;  %8076 = vmatprep.subr.mxu1 %v8733_v34 }
 0x4d3   :  { %8064 = vmatmul.mubr.msk.f32.vlgmr.msra.gmra.mrb[48].mxu0 %vm458_vm2, %v2003_v5 }
 0x4d4   :  { %8072 = vmatpush3.msra.mxu0 %v2199_v22  ;;  %8073 = vmatprep.mubr.msk.f32.mxu0 %vm8734_vm1, %v8733_v34 }
 0x4d5   :  { %8081 = vmatprep.subr.mxu0 %v8733_v34 }
 0x596   :  { %v2304_v21 = vpop.f32.mrb[40].mxu0 }
 0x597   :  { %v8030_v49 = vpop.f32.mrb[41].mxu0  ;;  %v2840_v50 = vsel %vm458_vm2, %v2304_v21, -inf }
 0x598   :  { %2841 = vmax.xlane.f32.xlu0 %v2840_v50 }
 0x59a   :  { %v2380_v51 = vpop.f32.mrb[42].mxu0  ;;  %v2456_v52 = vpop.f32.mrb[48].mxu1 }
 0x59b   :  { %v8035_v53 = vpop.f32.mrb[43].mxu0  ;;  %v8040_v54 = vpop.f32.mrb[49].mxu1  ;;  %v2846_v55 = vsel %vm458_vm2, %v2456_v52, -inf  ;;  %v2843_v56 = vsel %vm458_vm2, %v2380_v51, -inf }
 0x59c   :  { %2847 = vmax.xlane.f32.xlu0 %v2846_v55  ;;  %2844 = vmax.xlane.f32.xlu1 %v2843_v56 }
 0x59e   :  { %v2532_v57 = vpop.f32.mrb[44].mxu0  ;;  %v2608_v58 = vpop.f32.mrb[50].mxu1 }
 0x59f   :  { %v8045_v59 = vpop.f32.mrb[45].mxu0  ;;  %v8050_v60 = vpop.f32.mrb[51].mxu1  ;;  %v2852_v61 = vsel %vm458_vm2, %v2608_v58, -inf  ;;  %v2849_v62 = vsel %vm458_vm2, %v2532_v57, -inf }
 0x5a0   :  { %2853 = vmax.xlane.f32.xlu0 %v2852_v61  ;;  %2850 = vmax.xlane.f32.xlu1 %v2849_v62 }
 0x5a2   :  { %v2684_v63 = vpop.f32.mrb[46].mxu0  ;;  %v2760_v0 = vpop.f32.mrb[52].mxu1 }
 0x5a3   :  { %v8055_v1 = vpop.f32.mrb[47].mxu0  ;;  %v8060_v23 = vpop.f32.mrb[53].mxu1  ;;  %v2858_v24 = vsel %vm458_vm2, %v2760_v0, -inf  ;;  %v2855_v25 = vsel %vm458_vm2, %v2684_v63, -inf }
 0x5a4   :  { %2859 = vmax.xlane.f32.xlu0 %v2858_v24  ;;  %2856 = vmax.xlane.f32.xlu1 %v2855_v25 }
 0x5a6   :  { %v2836_v2 = vpop.f32.mrb[48].mxu0 }
 0x5a7   :  { %v8065_v26 = vpop.f32.mrb[49].mxu0  ;;  %v2861_v3 = vsel %vm458_vm2, %v2836_v2, -inf }
 0x5a8   :  { %2862 = vmax.xlane.f32.xlu1 %v2861_v3 }
 0x625   :  { %v2842_v4 = vpop.xlane.xlu0 %2841 }
 0x626   :  { %v2864_v27 = vsub.f32 %v2304_v21, %v2842_v4 }
 0x628   :  { %v2872_v6 = vmul.f32 1.442695, %v2864_v27 }
 0x629   :  { %v2848_v28 = vpop.xlane.xlu0 %2847  ;;  %v2845_v10 = vpop.xlane.xlu1 %2844 }
 0x62a   :  { %8597 = vpow2.f32 %v2872_v6  ;;  %v2866_v11 = vsub.f32 %v2456_v52, %v2848_v28  ;;  %v2865_v18 = vsub.f32 %v2380_v51, %v2845_v10 }
 0x62c   :  { %v2876_v12 = vmul.f32 1.442695, %v2866_v11  ;;  %v2874_v16 = vmul.f32 1.442695, %v2865_v18 }
 0x62d   :  { %v2854_v20 = vpop.xlane.xlu0 %2853  ;;  %v2851_v32 = vpop.xlane.xlu1 %2850 }
 0x62e   :  { %8599 = vpow2.f32 %v2876_v12  ;;  %v2868_v15 = vsub.f32 %v2608_v58, %v2854_v20  ;;  %v2867_v35 = vsub.f32 %v2532_v57, %v2851_v32  ;;  %v9298_v12 = vld [vmem:[%s9870_s0] sm:$0xff]  ;;  %v7359_v32 = vld [vmem:[%s9874_s4 + $0x48] sm:$0xff] }
 0x62f   :  { %8601 = vpow2.f32 %v2874_v16 }
 0x630   :  { %v2880_v37 = vmul.f32 1.442695, %v2868_v15  ;;  %v2878_v40 = vmul.f32 1.442695, %v2867_v35  ;;  %v7354_v35 = vld [vmem:[%s9872_s2 + $0x40] sm:$0xff] }
 0x631   :  { %v2860_v33 = vpop.xlane.xlu0 %2859  ;;  %v2857_v39 = vpop.xlane.xlu1 %2856 }
 0x632   :  { %8603 = vpow2.f32 %v2880_v37  ;;  %v2870_v41 = vsub.f32 %v2760_v0, %v2860_v33  ;;  %v2869_v31 = vsub.f32 %v2684_v63, %v2857_v39  ;;  %v2204_v0 = vadd.f32 %v9211_v45, %v9177_v29  ;;  %v7355_v37 = vld [vmem:[%s9872_s2 + $0x48] sm:$0xff]  ;;  %v7356_v33 = vld [vmem:[%s9872_s2 + $0x50] sm:$0xff]  ;;  %v7357_v39 = vld [vmem:[%s9872_s2 + $0x58] sm:$0xff] }
 0x633   :  { %8605 = vpow2.f32 %v2878_v40  ;;  %v2209_v29 = vadd.f32 %v9175_v7, %v9211_v45  ;;  %v2219_v7 = vadd.f32 %v9179_v8, %v9211_v45  ;;  %v2229_v8 = vadd.f32 %v9239_v13, %v9211_v45  ;;  %v7358_v13 = vld [vmem:[%s9874_s4 + $0x40] sm:$0xff] }
 0x634   :  { %v8598_v38 = vpop.eup %8597  ;;  %v2884_v36 = vmul.f32 1.442695, %v2870_v41  ;;  %v2882_v42 = vmul.f32 1.442695, %v2869_v31  ;;  %v9315_v15 = vpack.c.bf16 %v7359_v32, %v7358_v13  ;;  %v8476_v40 = vpack.c.bf16 %v7355_v37, %v7354_v35  ;;  %v9333_v31 = vld [vmem:[%s9870_s0 + $0x8] sm:$0xff] }
 0x635   :  { %v2863_v43 = vpop.xlane.xlu1 %2862  ;;  %v2888_v9 = vsel %vm458_vm2, %v8598_v38, 0.0  ;;  %v8480_v41 = vpack.c.bf16 %v7357_v39, %v7356_v33 }
 0x636   :  { %8607 = vpow2.f32 %v2884_v36  ;;  %v2871_v44 = vsub.f32 %v2836_v2, %v2863_v43  ;;  %2889 = vadd.xlane.f32.xlu0 %v2888_v9  ;;  %v2214_v2 = vadd.f32 %v9211_v45, %v9181_v30  ;;  %v2224_v30 = vadd.f32 %v9211_v45, %v9241_v17  ;;  %v7291_v45 = vld [vmem:[%s9878_s8 + $0x8] sm:$0xff]  ;;  %v9347_v36 = vld [vmem:[%s9870_s0 + $0x18] sm:$0xff]  ;;  %v9368_v9 = vld [vmem:[%s9870_s0 + $0x30] sm:$0xff] }
 0x637   :  { %8609 = vpow2.f32 %v2882_v42  ;;  %v9354_v42 = vld [vmem:[%s9870_s0 + $0x20] sm:$0xff]  ;;  %v9361_v43 = vld [vmem:[%s9870_s0 + $0x28] sm:$0xff] }
 0x638   :  { %v8600_v46 = vpop.eup %8599  ;;  %v2886_v47 = vmul.f32 1.442695, %v2871_v44  ;;  %v7362_v44 = vld [vmem:[%s9876_s6 + $0x40] sm:$0xff] }
 0x639   :  { %v8602_v48 = vpop.eup %8601  ;;  %v2894_v14 = vsel %vm458_vm2, %v8600_v46, 0.0 }
 0x63a   :  { %8611 = vpow2.f32 %v2886_v47  ;;  %2895 = vadd.xlane.f32.xlu0 %v2894_v14  ;;  %v2891_v19 = vsel %vm458_vm2, %v8602_v48, 0.0  ;;  %v7364_v47 = vld [vmem:[%s9876_s6 + $0x50] sm:$0xff]  ;;  %v7365_v14 = vld [vmem:[%s9876_s6 + $0x58] sm:$0xff] }
 0x63b   :  { %2892 = vadd.xlane.f32.xlu1 %v2891_v19  ;;  %v8496_v19 = vpack.c.bf16 %v7365_v14, %v7364_v47  ;;  %v7368_v47 = vld [vmem:[%s9873_s3 + $0x2] ss:$0 sm:$0xff] }
 0x63c   :  { %v8604_v22 = vpop.eup %8603 }
 0x63d   :  { %v8606_v5 = vpop.eup %8605  ;;  %v2900_v21 = vsel %vm458_vm2, %v8604_v22, 0.0 }
 0x63e   :  { %2901 = vadd.xlane.f32.xlu0 %v2900_v21  ;;  %v2897_v49 = vsel %vm458_vm2, %v8606_v5, 0.0  ;;  %v9402_v21 = vld [vmem:[%s9871_s1 + $0x8] sm:$0xff] }
 0x63f   :  { %2898 = vadd.xlane.f32.xlu1 %v2897_v49  ;;  %v9409_v49 = vld [vmem:[%s9871_s1 + $0x10] sm:$0xff] }
 0x640   :  { %v8608_v50 = vpop.eup %8607 }
 0x641   :  { %v8610_v51 = vpop.eup %8609  ;;  %v2906_v52 = vsel %vm458_vm2, %v8608_v50, 0.0 }
 0x642   :  { %2907 = vadd.xlane.f32.xlu0 %v2906_v52  ;;  %v2903_v53 = vsel %vm458_vm2, %v8610_v51, 0.0  ;;  %v9430_v52 = vld [vmem:[%s9871_s1 + $0x28] sm:$0xff] }
 0x643   :  { %2904 = vadd.xlane.f32.xlu1 %v2903_v53  ;;  %v9437_v53 = vld [vmem:[%s9871_s1 + $0x30] sm:$0xff] }
 0x644   :  { %v9258_v54 = vpop.eup %8611 }
 0x645   :  { %v2909_v55 = vsel %vm458_vm2, %v9258_v54, 0.0 }
 0x647   :  { %2910 = vadd.xlane.f32.xlu1 %v2909_v55 }
 0x6c3   :  { %v2890_v56 = vpop.xlane.xlu0 %2889 }
 0x6c4   :  { %8613 = vrcp.f32 %v2890_v56 }
 0x6c7   :  { %v2896_v57 = vpop.xlane.xlu0 %2895 }
 0x6c8   :  { %8615 = vrcp.f32 %v2896_v57  ;;  %v2893_v58 = vpop.xlane.xlu1 %2892  ;;  %v7360_v57 = vld [vmem:[%s9874_s4 + $0x50] sm:$0xff] }
 0x6c9   :  { %8617 = vrcp.f32 %v2893_v58  ;;  %v7361_v58 = vld [vmem:[%s9874_s4 + $0x58] sm:$0xff] }
 0x6cb   :  { %v2902_v59 = vpop.xlane.xlu0 %2901 }
 0x6cc   :  { %8619 = vrcp.f32 %v2902_v59  ;;  %v2899_v60 = vpop.xlane.xlu1 %2898 }
 0x6cd   :  { %8621 = vrcp.f32 %v2899_v60  ;;  %v8488_v60 = vpack.c.bf16 %v7361_v58, %v7360_v57 }
 0x6ce   :  { %v8614_v61 = vpop.eup %8613 }
 0x6cf   :  { %v2920_v62 = vmul.f32 %v8614_v61, %v8598_v38  ;;  %v2908_v63 = vpop.xlane.xlu0 %2907  ;;  %v9340_v38 = vld [vmem:[%s9870_s0 + $0x10] sm:$0xff] }
 0x6d0   :  { %8623 = vrcp.f32 %v2908_v63  ;;  %v2905_v1 = vpop.xlane.xlu1 %2904 }
 0x6d1   :  { %8625 = vrcp.f32 %v2905_v1  ;;  %8069 = vmatmul.mubr.msk.f32.vlgmr.msra.gmra.mrb[54].mxu1 %vm458_vm2, %v2920_v62 }
 0x6d2   :  { %v8616_v23 = vpop.eup %8615  ;;  %8077 = vmatpush3.msra.mxu1 %v2204_v0  ;;  %8078 = vmatprep.mubr.msk.f32.mxu1 %vm8734_vm1, %v8733_v34 }
 0x6d3   :  { %v8618_v24 = vpop.eup %8617  ;;  %v2922_v25 = vmul.f32 %v8616_v23, %v8600_v46  ;;  %8086 = vmatprep.subr.mxu1 %v8733_v34  ;;  %v7363_v46 = vld [vmem:[%s9876_s6 + $0x48] sm:$0xff] }
 0x6d4   :  { %v2921_v26 = vmul.f32 %v8618_v24, %v8602_v48  ;;  %v2911_v3 = vpop.xlane.xlu1 %2910  ;;  %v8492_v48 = vpack.c.bf16 %v7363_v46, %v7362_v44  ;;  %v7378_v46 = vld [vmem:[%s9875_s5 + $0x2] ss:$0 sm:$0xff] }
 0x6d5   :  { %8627 = vrcp.f32 %v2911_v3  ;;  %8079 = vmatmul.mubr.msk.f32.vlgmr.msra.gmra.mrb[56].mxu1 %vm458_vm2, %v2922_v25 }
 0x6d6   :  { %v8620_v4 = vpop.eup %8619  ;;  %8074 = vmatmul.mubr.msk.f32.vlgmr.msra.gmra.mrb[50].mxu0 %vm458_vm2, %v2921_v26  ;;  %8087 = vmatpush3.msra.mxu1 %v2214_v2 }
 0x6d7   :  { %v8622_v27 = vpop.eup %8621  ;;  %v2924_v6 = vmul.f32 %v8620_v4, %v8604_v22  ;;  %8082 = vmatpush3.msra.mxu0 %v2209_v29  ;;  %8083 = vmatprep.mubr.msk.f32.mxu0 %vm8734_vm1, %v8733_v34  ;;  %v9387_v22 = vld [vmem:[%s9870_s0 + $0x38] sm:$0xff] }
 0x6d8   :  { %v2923_v28 = vmul.f32 %v8622_v27, %v8606_v5  ;;  %8088 = vmatprep.mubr.msk.f32.mxu1 %vm8734_vm1, %v8733_v34  ;;  %8091 = vmatprep.subr.mxu0 %v8733_v34  ;;  %v9394_v5 = vld [vmem:[%s9871_s1] sm:$0xff] }
 0x6d9   :  { %8096 = vmatprep.subr.mxu1 %v8733_v34  ;;  %8089 = vmatmul.mubr.msk.f32.vlgmr.msra.gmra.mrb[58].mxu1 %vm458_vm2, %v2924_v6 }
 0x6da   :  { %v8624_v10 = vpop.eup %8623  ;;  %8084 = vmatmul.mubr.msk.f32.vlgmr.msra.gmra.mrb[52].mxu0 %vm458_vm2, %v2923_v28  ;;  %8097 = vmatpush3.msra.mxu1 %v2224_v30 }
 0x6db   :  { %v8626_v11 = vpop.eup %8625  ;;  %v2926_v18 = vmul.f32 %v8624_v10, %v8608_v50  ;;  %8092 = vmatpush3.msra.mxu0 %v2219_v7  ;;  %8093 = vmatprep.mubr.msk.f32.mxu0 %vm8734_vm1, %v8733_v34  ;;  %v9416_v50 = vld [vmem:[%s9871_s1 + $0x18] sm:$0xff] }
 0x6dc   :  { %v2925_v17 = vmul.f32 %v8626_v11, %v8610_v51  ;;  %8098 = vmatprep.mubr.msk.f32.mxu1 %vm8734_vm1, %v8733_v34  ;;  %8101 = vmatprep.subr.mxu0 %v8733_v34  ;;  %v9423_v51 = vld [vmem:[%s9871_s1 + $0x20] sm:$0xff] }
 0x6dd   :  { %8099 = vmatmul.mubr.msk.f32.vlgmr.msra.gmra.mrb[60].mxu1 %vm458_vm2, %v2926_v18  ;;  %8477 = vmatprep.subr.bf16.mxu1 %v8476_v40 }
 0x6de   :  { %8094 = vmatmul.mubr.msk.f32.vlgmr.msra.gmra.mrb[54].mxu0 %vm458_vm2, %v2925_v17  ;;  %8128 = vmatprep.mubr.msk.f32.mxu1 %vm80_vm0, %v9298_v12 }
 0x6df   :  { %v8628_v16 = vpop.eup %8627  ;;  %8102 = vmatpush3.msra.mxu0 %v2229_v8  ;;  %8103 = vmatprep.mubr.msk.f32.mxu0 %vm8734_vm1, %v8733_v34 }
 0x6e0   :  { %v2927_v20 = vmul.f32 %v8628_v16, %v9258_v54  ;;  %8106 = vmatprep.subr.mxu0 %v7291_v45  ;;  %8479 = vmatpush3.bf16.msra.mxu1 %v8476_v40  ;;  %v9444_v54 = vld [vmem:[%s9871_s1 + $0x38] sm:$0xff]  ;;  %v9491_v16 = vld [vmem:[%s9877_s7 + $0x2] ss:$0 sm:$0xff] }
 0x6e1   :  { %8481 = vmatprep.subr.bf16.mxu1 %v8480_v41 }
 0x6e2   :  { %8104 = vmatmul.mubr.msk.f32.vlgmr.msra.gmra.mrb[56].mxu0 %vm458_vm2, %v2927_v20 }
 0x6e3   :  { %8107 = vmatpush3.msra.mxu0 %v7291_v45 }
 0x6e4   :  { %8485 = vmatprep.subr.bf16.mxu0 %v9315_v15  ;;  %8483 = vmatpush3.bf16.msra.mxu1 %v8480_v41 }
 0x6e5   :  { %8493 = vmatprep.subr.bf16.mxu1 %v8492_v48 }
 0x6e7   :  { %8129 = vmatmul.mubr.msk.f32.vlgmr.msra.gmra.mrb[62].mxu1 %vm80_vm0, %v9333_v31 }
 0x6e8   :  { %8131 = vmatprep.mubr.msk.f32.mxu1 %vm80_vm0, %v9340_v38  ;;  %8495 = vmatpush3.bf16.msra.mxu1 %v8492_v48 }
 0x6e9   :  { %8497 = vmatprep.subr.bf16.mxu1 %v8496_v19 }
 0x6eb   :  { %8132 = vmatmul.mubr.msk.f32.gmra.mrb[64].mxu1 %vm80_vm0, %v9347_v36 }
 0x6ec   :  { %8134 = vmatprep.mubr.msk.f32.mxu1 %vm80_vm0, %v9354_v42  ;;  %8499 = vmatpush3.bf16.msra.mxu1 %v8496_v19 }
 0x6ed   :  { %8185 = vmatprep.subr.mxu1 %v8733_v34 }
 0x6ef   :  { %8135 = vmatmul.mubr.msk.f32.gmra.mrb[66].mxu1 %vm80_vm0, %v9361_v43 }
 0x6f0   :  { %8137 = vmatprep.mubr.msk.f32.mxu1 %vm80_vm0, %v9368_v9 }
 0x6f3   :  { %8138 = vmatmul.mubr.msk.f32.gmra.mrb[68].mxu1 %vm80_vm0, %v9387_v22 }
 0x6f4   :  { %8168 = vmatprep.mubr.msk.f32.mxu1 %vm80_vm0, %v9394_v5 }
 0x6f7   :  { %8169 = vmatmul.mubr.msk.f32.vlgmr.msra.gmra.mrb[70].mxu1 %vm80_vm0, %v9402_v21 }
 0x6f8   :  { %8171 = vmatprep.mubr.msk.f32.mxu1 %vm80_vm0, %v9409_v49 }
 0x6fb   :  { %8172 = vmatmul.mubr.msk.f32.gmra.mrb[72].mxu1 %vm80_vm0, %v9416_v50 }
 0x6fc   :  { %8174 = vmatprep.mubr.msk.f32.mxu1 %vm80_vm0, %v9423_v51 }
 0x6ff   :  { %8175 = vmatmul.mubr.msk.f32.gmra.mrb[74].mxu1 %vm80_vm0, %v9430_v52 }
 0x700   :  { %8177 = vmatprep.mubr.msk.f32.mxu1 %vm80_vm0, %v9437_v53 }
 0x703   :  { %8178 = vmatmul.mubr.msk.f32.gmra.mrb[76].mxu1 %vm80_vm0, %v9444_v54 }
 0x704   :  { %8187 = vmatprep.mubr.msk.f32.mxu1 %vm8734_vm1, %v8733_v34 }
 0x7a4   :  { %v2997_v55 = vpop.f32.mrb[54].mxu1 }
 0x7a5   :  { %v8070_v56 = vpop.f32.mrb[55].mxu1  ;;  %8108 = vmatprep.mubr.msk.f32.mxu0 %vm458_vm2, %v2997_v55 }
 0x7a8   :  { %v3143_v59 = vpop.f32.mrb[56].mxu1 }
 0x7a9   :  { %v3070_v61 = vpop.f32.mrb[50].mxu0  ;;  %v8080_v62 = vpop.f32.mrb[57].mxu1 }
 0x7aa   :  { %v8075_v63 = vpop.f32.mrb[51].mxu0  ;;  %8109 = vmatmul.mubr.msk.f32.vlgmr.msra.gmra.mrb[24].mxu0 %vm458_vm2, %v3070_v61 }
 0x7ab   :  { %8111 = vmatprep.mubr.msk.f32.mxu0 %vm458_vm2, %v3143_v59  ;;  %8487 = vmatpush3.bf16.msra.mxu0 %v9315_v15 }
 0x7ac   :  { %v3289_v0 = vpop.f32.mrb[58].mxu1  ;;  %8489 = vmatprep.subr.bf16.mxu0 %v8488_v60 }
 0x7ad   :  { %v3216_v1 = vpop.f32.mrb[52].mxu0  ;;  %v8090_v23 = vpop.f32.mrb[59].mxu1 }
 0x7ae   :  { %v8085_v24 = vpop.f32.mrb[53].mxu0  ;;  %8112 = vmatmul.mubr.msk.f32.gmra.mrb[26].mxu0 %vm458_vm2, %v3216_v1 }
 0x7af   :  { %8114 = vmatprep.mubr.msk.f32.mxu0 %vm458_vm2, %v3289_v0  ;;  %8491 = vmatpush3.bf16.msra.mxu0 %v8488_v60 }
 0x7b0   :  { %v3435_v25 = vpop.f32.mrb[60].mxu1  ;;  %8180 = vmatprep.subr.mxu0 %v8733_v34 }
 0x7b1   :  { %v3362_v2 = vpop.f32.mrb[54].mxu0  ;;  %v8100_v26 = vpop.f32.mrb[61].mxu1 }
 0x7b2   :  { %v8095_v3 = vpop.f32.mrb[55].mxu0  ;;  %8115 = vmatmul.mubr.msk.f32.gmra.mrb[28].mxu0 %vm458_vm2, %v3362_v2 }
 0x7b3   :  { %8117 = vmatprep.mubr.msk.f32.mxu0 %vm458_vm2, %v3435_v25 }
 0x7b5   :  { %v3508_v29 = vpop.f32.mrb[56].mxu0 }
 0x7b6   :  { %v8105_v4 = vpop.f32.mrb[57].mxu0  ;;  %8118 = vmatmul.mubr.msk.f32.gmra.mrb[30].mxu0 %vm458_vm2, %v3508_v29 }
 0x7b7   :  { %8148 = vmatprep.mubr.msk.f32.mxu0 %vm80_vm0, %v9394_v5 }
 0x7ba   :  { %8149 = vmatmul.mubr.msk.f32.vlgmr.msra.gmra.mrb[58].mxu0 %vm80_vm0, %v9402_v21  ;;  %v8130_v27 = vpop.f32.mrb[62].mxu1 }
 0x7bb   :  { %8151 = vmatprep.mubr.msk.f32.mxu0 %vm80_vm0, %v9409_v49  ;;  %v3740_v6 = vpop.f32.mrb[63].mxu1  ;;  %v3746_v56 = vadd.f32 %v8130_v27, %v7368_v47 }
 0x7bc   :  { %v3741_v57 = vadd.f32 %v7368_v47, %v3740_v6 }
 0x7be   :  { %8152 = vmatmul.mubr.msk.f32.gmra.mrb[60].mxu0 %vm80_vm0, %v9416_v50  ;;  %v8133_v30 = vpop.f32.mrb[64].mxu1 }
 0x7bf   :  { %8154 = vmatprep.mubr.msk.f32.mxu0 %vm80_vm0, %v9423_v51  ;;  %v3750_v28 = vpop.f32.mrb[65].mxu1  ;;  %v3756_v62 = vadd.f32 %v8133_v30, %v7368_v47 }
 0x7c0   :  { %v3751_v63 = vadd.f32 %v7368_v47, %v3750_v28 }
 0x7c2   :  { %8155 = vmatmul.mubr.msk.f32.gmra.mrb[62].mxu0 %vm80_vm0, %v9430_v52  ;;  %v8136_v7 = vpop.f32.mrb[66].mxu1 }
 0x7c3   :  { %8157 = vmatprep.mubr.msk.f32.mxu0 %vm80_vm0, %v9437_v53  ;;  %v3760_v10 = vpop.f32.mrb[67].mxu1  ;;  %v3766_v25 = vadd.f32 %v8136_v7, %v7368_v47 }
 0x7c4   :  { %v3761_v2 = vadd.f32 %v7368_v47, %v3760_v10 }
 0x7c6   :  { %8158 = vmatmul.mubr.msk.f32.gmra.mrb[64].mxu0 %vm80_vm0, %v9444_v54  ;;  %v8139_v11 = vpop.f32.mrb[68].mxu1 }
 0x7c7   :  { %8182 = vmatprep.mubr.msk.f32.mxu0 %vm8734_vm1, %v8733_v34  ;;  %v3770_v18 = vpop.f32.mrb[69].mxu1  ;;  %v3776_v27 = vadd.f32 %v8139_v11, %v7368_v47 }
 0x7c8   :  { %v3771_v6 = vadd.f32 %v7368_v47, %v3770_v18 }
 0x7ca   :  { %v9484_v17 = vpop.f32.mrb[70].mxu1 }
 0x7cb   :  { %v9486_v8 = vpop.f32.mrb[71].mxu1  ;;  %v3972_v30 = vadd.f32 %v9484_v17, %v9491_v16 }
 0x7cc   :  { %v3967_v28 = vadd.f32 %v9491_v16, %v9486_v8 }
 0x7ce   :  { %v8173_v20 = vpop.f32.mrb[72].mxu1 }
 0x7cf   :  { %v9494_v45 = vadd.f32 %v8173_v20, %v9491_v16  ;;  %v3976_v13 = vpop.f32.mrb[73].mxu1 }
 0x7d0   :  { %v9497_v32 = vadd.f32 %v9491_v16, %v3976_v13 }
 0x7d2   :  { %v8176_v15 = vpop.f32.mrb[74].mxu1 }
 0x7d3   :  { %v9500_v35 = vadd.f32 %v8176_v15, %v9491_v16  ;;  %v3986_v37 = vpop.f32.mrb[75].mxu1 }
 0x7d4   :  { %v9503_v40 = vadd.f32 %v9491_v16, %v3986_v37 }
 0x7d6   :  { %v8179_v33 = vpop.f32.mrb[76].mxu1 }
 0x7d7   :  { %v9506_v39 = vadd.f32 %v8179_v33, %v9491_v16  ;;  %v3996_v41 = vpop.f32.mrb[77].mxu1 }
 0x7d8   :  { %v9509_v44 = vadd.f32 %v9491_v16, %v3996_v41 }
 0x88d   :  { %v8150_v48 = vpop.f32.mrb[58].mxu0 }
 0x88e   :  { %v3859_v14 = vadd.f32 %v8150_v48, %v7378_v46  ;;  %v3853_v19 = vpop.f32.mrb[59].mxu0 }
 0x88f   :  { %v3854_v55 = vadd.f32 %v7378_v46, %v3853_v19 }
 0x890   :  { %8186 = vmatpush3.xpose.msk.msra.mxu1 %vm458_vm2, %v3859_v14 }
 0x891   :  { %v8153_v58 = vpop.f32.mrb[60].mxu0  ;;  %8181 = vmatpush3.xpose.msk.msra.mxu0 %vm458_vm2, %v3854_v55  ;;  %8195 = vmatprep.subr.mxu1 %v8733_v34 }
 0x892   :  { %v3869_v59 = vadd.f32 %v8153_v58, %v7378_v46  ;;  %v3863_v60 = vpop.f32.mrb[61].mxu0  ;;  %8190 = vmatprep.subr.mxu0 %v8733_v34 }
 0x893   :  { %v3864_v61 = vadd.f32 %v7378_v46, %v3863_v60  ;;  %8188 = vmatmul.mubr.msk.f32.vlgmr.msra.gmra.mrb[78].mxu1 %vm458_vm2, %v3746_v56 }
 0x894   :  { %8183 = vmatmul.mubr.msk.f32.vlgmr.msra.gmra.mrb[66].mxu0 %vm458_vm2, %v3741_v57  ;;  %8196 = vmatpush3.xpose.msk.msra.mxu1 %vm458_vm2, %v3869_v59 }
 0x895   :  { %v8156_v0 = vpop.f32.mrb[62].mxu0  ;;  %8191 = vmatpush3.xpose.msk.msra.mxu0 %vm458_vm2, %v3864_v61  ;;  %8197 = vmatprep.mubr.msk.f32.mxu1 %vm8734_vm1, %v8733_v34 }
 0x896   :  { %v3879_v1 = vadd.f32 %v8156_v0, %v7378_v46  ;;  %v3873_v23 = vpop.f32.mrb[63].mxu0  ;;  %8192 = vmatprep.mubr.msk.f32.mxu0 %vm8734_vm1, %v8733_v34  ;;  %8205 = vmatprep.subr.mxu1 %v8733_v34 }
 0x897   :  { %v3874_v24 = vadd.f32 %v7378_v46, %v3873_v23  ;;  %8198 = vmatmul.mubr.msk.f32.vlgmr.msra.gmra.mrb[80].mxu1 %vm458_vm2, %v3756_v62  ;;  %8200 = vmatprep.subr.mxu0 %v8733_v34 }
 0x898   :  { %8193 = vmatmul.mubr.msk.f32.vlgmr.msra.gmra.mrb[68].mxu0 %vm458_vm2, %v3751_v63  ;;  %8206 = vmatpush3.xpose.msk.msra.mxu1 %vm458_vm2, %v3879_v1 }
 0x899   :  { %v8159_v26 = vpop.f32.mrb[64].mxu0  ;;  %8201 = vmatpush3.xpose.msk.msra.mxu0 %vm458_vm2, %v3874_v24  ;;  %8207 = vmatprep.mubr.msk.f32.mxu1 %vm8734_vm1, %v8733_v34 }
 0x89a   :  { %v3889_v3 = vadd.f32 %v8159_v26, %v7378_v46  ;;  %v3883_v29 = vpop.f32.mrb[65].mxu0  ;;  %8202 = vmatprep.mubr.msk.f32.mxu0 %vm8734_vm1, %v8733_v34  ;;  %8215 = vmatprep.subr.mxu1 %v8733_v34 }
 0x89b   :  { %v3884_v4 = vadd.f32 %v7378_v46, %v3883_v29  ;;  %8208 = vmatmul.mubr.msk.f32.vlgmr.msra.gmra.mrb[82].mxu1 %vm458_vm2, %v3766_v25  ;;  %8210 = vmatprep.subr.mxu0 %v8733_v34 }
 0x89c   :  { %8203 = vmatmul.mubr.msk.f32.vlgmr.msra.gmra.mrb[70].mxu0 %vm458_vm2, %v3761_v2  ;;  %8216 = vmatpush3.xpose.msk.msra.mxu1 %vm458_vm2, %v3889_v3 }
 0x89d   :  { %8211 = vmatpush3.xpose.msk.msra.mxu0 %vm458_vm2, %v3884_v4  ;;  %8217 = vmatprep.mubr.msk.f32.mxu1 %vm8734_vm1, %v8733_v34 }
 0x89e   :  { %8212 = vmatprep.mubr.msk.f32.mxu0 %vm8734_vm1, %v8733_v34  ;;  %8220 = vmatprep.subr.mxu0 %v8733_v34 }
 0x89f   :  { %8218 = vmatmul.mubr.msk.f32.vlgmr.msra.gmra.mrb[84].mxu1 %vm458_vm2, %v3776_v27  ;;  %8225 = vmatprep.subr.mxu1 %v8733_v34 }
 0x8a0   :  { %8213 = vmatmul.mubr.msk.f32.vlgmr.msra.gmra.mrb[72].mxu0 %vm458_vm2, %v3771_v6  ;;  %8226 = vmatpush3.msra.mxu1 %v3972_v30 }
 0x8a1   :  { %8221 = vmatpush3.msra.mxu0 %v3967_v28  ;;  %8227 = vmatprep.mubr.msk.f32.mxu1 %vm8734_vm1, %v8733_v34 }
 0x8a2   :  { %8235 = vmatprep.subr.mxu1 %v8733_v34  ;;  %8222 = vmatprep.mubr.msk.f32.mxu0 %vm8734_vm1, %v8733_v34 }
 0x8a3   :  { %8230 = vmatprep.subr.mxu0 %v8733_v34 }
 0x966   :  { %v4153_v7 = vpop.f32.mrb[78].mxu1 }
 0x967   :  { %v4077_v10 = vpop.f32.mrb[66].mxu0  ;;  %v8189_v11 = vpop.f32.mrb[79].mxu1  ;;  %v4616_v18 = vsel %vm458_vm2, %v4153_v7, -inf }
 0x968   :  { %4617 = vmax.xlane.f32.xlu1 %v4616_v18  ;;  %v8184_v17 = vpop.f32.mrb[67].mxu0  ;;  %v4613_v8 = vsel %vm458_vm2, %v4077_v10, -inf }
 0x969   :  { %4614 = vmax.xlane.f32.xlu0 %v4613_v8 }
 0x96a   :  { %v4305_v16 = vpop.f32.mrb[80].mxu1 }
 0x96b   :  { %v4229_v20 = vpop.f32.mrb[68].mxu0  ;;  %v8199_v13 = vpop.f32.mrb[81].mxu1  ;;  %v4622_v15 = vsel %vm458_vm2, %v4305_v16, -inf }
 0x96c   :  { %4623 = vmax.xlane.f32.xlu1 %v4622_v15  ;;  %v8194_v37 = vpop.f32.mrb[69].mxu0  ;;  %v4619_v33 = vsel %vm458_vm2, %v4229_v20, -inf }
 0x96d   :  { %4620 = vmax.xlane.f32.xlu0 %v4619_v33 }
 0x96e   :  { %v4457_v41 = vpop.f32.mrb[82].mxu1 }
 0x96f   :  { %v4381_v46 = vpop.f32.mrb[70].mxu0  ;;  %v8209_v47 = vpop.f32.mrb[83].mxu1  ;;  %v4628_v48 = vsel %vm458_vm2, %v4457_v41, -inf }
 0x970   :  { %4629 = vmax.xlane.f32.xlu1 %v4628_v48  ;;  %v8204_v14 = vpop.f32.mrb[71].mxu0  ;;  %v4625_v19 = vsel %vm458_vm2, %v4381_v46, -inf }
 0x971   :  { %4626 = vmax.xlane.f32.xlu0 %v4625_v19 }
 0x972   :  { %v4609_v55 = vpop.f32.mrb[84].mxu1 }
 0x973   :  { %v4533_v56 = vpop.f32.mrb[72].mxu0  ;;  %v8219_v57 = vpop.f32.mrb[85].mxu1  ;;  %v4634_v58 = vsel %vm458_vm2, %v4609_v55, -inf }
 0x974   :  { %4635 = vmax.xlane.f32.xlu1 %v4634_v58  ;;  %v8214_v59 = vpop.f32.mrb[73].mxu0  ;;  %v4631_v60 = vsel %vm458_vm2, %v4533_v56, -inf }
 0x975   :  { %4632 = vmax.xlane.f32.xlu0 %v4631_v60 }
 0x9f5   :  { %v4618_v61 = vpop.xlane.xlu1 %4617 }
 0x9f6   :  { %v4638_v62 = vsub.f32 %v4153_v7, %v4618_v61  ;;  %v4615_v63 = vpop.xlane.xlu0 %4614 }
 0x9f7   :  { %v4637_v0 = vsub.f32 %v4077_v10, %v4615_v63 }
 0x9f8   :  { %v4647_v1 = vmul.f32 1.442695, %v4638_v62 }
 0x9f9   :  { %v4645_v23 = vmul.f32 1.442695, %v4637_v0  ;;  %v4624_v24 = vpop.xlane.xlu1 %4623 }
 0x9fa   :  { %8629 = vpow2.f32 %v4647_v1  ;;  %v4640_v25 = vsub.f32 %v4305_v16, %v4624_v24  ;;  %v4621_v2 = vpop.xlane.xlu0 %4620 }
 0x9fb   :  { %8631 = vpow2.f32 %v4645_v23  ;;  %v4639_v26 = vsub.f32 %v4229_v20, %v4621_v2 }
 0x9fc   :  { %v4651_v3 = vmul.f32 1.442695, %v4640_v25 }
 0x9fd   :  { %v4649_v29 = vmul.f32 1.442695, %v4639_v26  ;;  %v4630_v4 = vpop.xlane.xlu1 %4629 }
 0x9fe   :  { %8633 = vpow2.f32 %v4651_v3  ;;  %v4642_v27 = vsub.f32 %v4457_v41, %v4630_v4  ;;  %v4627_v6 = vpop.xlane.xlu0 %4626 }
 0x9ff   :  { %8635 = vpow2.f32 %v4649_v29  ;;  %v4641_v30 = vsub.f32 %v4381_v46, %v4627_v6 }
 0xa00   :  { %v4655_v28 = vmul.f32 1.442695, %v4642_v27 }
 0xa01   :  { %v4653_v7 = vmul.f32 1.442695, %v4641_v30  ;;  %v4636_v11 = vpop.xlane.xlu1 %4635 }
 0xa02   :  { %8637 = vpow2.f32 %v4655_v28  ;;  %v4644_v10 = vsub.f32 %v4609_v55, %v4636_v11  ;;  %v4633_v18 = vpop.xlane.xlu0 %4632 }
 0xa03   :  { %8639 = vpow2.f32 %v4653_v7  ;;  %v4643_v17 = vsub.f32 %v4533_v56, %v4633_v18 }
 0xa04   :  { %v8630_v8 = vpop.eup %8629  ;;  %v4659_v16 = vmul.f32 1.442695, %v4644_v10  ;;  %v7434_v10 = vld [vmem:[%s9874_s4 + $0x68] sm:$0xff] }
 0xa05   :  { %v8632_v13 = vpop.eup %8631  ;;  %v4657_v20 = vmul.f32 1.442695, %v4643_v17  ;;  %v4664_v15 = vsel %vm458_vm2, %v8630_v8, 0.0  ;;  %v7429_v17 = vld [vmem:[%s9872_s2 + $0x60] sm:$0xff] }
 0xa06   :  { %8641 = vpow2.f32 %v4659_v16  ;;  %4665 = vadd.xlane.f32.xlu1 %v4664_v15  ;;  %v4661_v37 = vsel %vm458_vm2, %v8632_v13, 0.0  ;;  %v7431_v16 = vld [vmem:[%s9872_s2 + $0x70] sm:$0xff]  ;;  %v7437_v15 = vld [vmem:[%s9876_s6 + $0x60] sm:$0xff] }
 0xa07   :  { %8643 = vpow2.f32 %v4657_v20  ;;  %4662 = vadd.xlane.f32.xlu0 %v4661_v37 }
 0xa08   :  { %v8634_v33 = vpop.eup %8633 }
 0xa09   :  { %v8636_v41 = vpop.eup %8635  ;;  %v4670_v46 = vsel %vm458_vm2, %v8634_v33, 0.0 }
 0xa0a   :  { %4671 = vadd.xlane.f32.xlu1 %v4670_v46  ;;  %v4667_v47 = vsel %vm458_vm2, %v8636_v41, 0.0 }
 0xa0b   :  { %4668 = vadd.xlane.f32.xlu0 %v4667_v47 }
 0xa0c   :  { %v8638_v48 = vpop.eup %8637 }
 0xa0d   :  { %v8640_v14 = vpop.eup %8639  ;;  %v4676_v19 = vsel %vm458_vm2, %v8638_v48, 0.0 }
 0xa0e   :  { %4677 = vadd.xlane.f32.xlu1 %v4676_v19  ;;  %v4673_v55 = vsel %vm458_vm2, %v8640_v14, 0.0 }
 0xa0f   :  { %4674 = vadd.xlane.f32.xlu0 %v4673_v55 }
 0xa10   :  { %v8642_v56 = vpop.eup %8641 }
 0xa11   :  { %v8644_v57 = vpop.eup %8643  ;;  %v4682_v58 = vsel %vm458_vm2, %v8642_v56, 0.0 }
 0xa12   :  { %4683 = vadd.xlane.f32.xlu1 %v4682_v58  ;;  %v4679_v59 = vsel %vm458_vm2, %v8644_v57, 0.0 }
 0xa13   :  { %4680 = vadd.xlane.f32.xlu0 %v4679_v59 }
 0xa93   :  { %v4666_v60 = vpop.xlane.xlu1 %4665 }
 0xa94   :  { %8645 = vrcp.f32 %v4666_v60  ;;  %v4663_v61 = vpop.xlane.xlu0 %4662 }
 0xa95   :  { %8647 = vrcp.f32 %v4663_v61 }
 0xa97   :  { %v4672_v62 = vpop.xlane.xlu1 %4671 }
 0xa98   :  { %8649 = vrcp.f32 %v4672_v62  ;;  %v4669_v63 = vpop.xlane.xlu0 %4668 }
 0xa99   :  { %8651 = vrcp.f32 %v4669_v63 }
 0xa9b   :  { %v4678_v0 = vpop.xlane.xlu1 %4677 }
 0xa9c   :  { %8653 = vrcp.f32 %v4678_v0  ;;  %v4675_v1 = vpop.xlane.xlu0 %4674 }
 0xa9d   :  { %8655 = vrcp.f32 %v4675_v1 }
 0xa9e   :  { %v8646_v23 = vpop.eup %8645 }
 0xa9f   :  { %v8648_v24 = vpop.eup %8647  ;;  %v4694_v25 = vmul.f32 %v8646_v23, %v8630_v8  ;;  %v4684_v2 = vpop.xlane.xlu1 %4683 }
 0xaa0   :  { %v4693_v26 = vmul.f32 %v8648_v24, %v8632_v13  ;;  %8657 = vrcp.f32 %v4684_v2  ;;  %v4681_v3 = vpop.xlane.xlu0 %4680  ;;  %v7432_v13 = vld [vmem:[%s9872_s2 + $0x78] sm:$0xff] }
 0xaa1   :  { %8659 = vrcp.f32 %v4681_v3  ;;  %8228 = vmatmul.mubr.msk.f32.vlgmr.msra.gmra.mrb[86].mxu1 %vm458_vm2, %v4694_v25  ;;  %v8504_v20 = vpack.c.bf16 %v7432_v13, %v7431_v16  ;;  %v7443_v3 = vld [vmem:[%s9873_s3 + $0x3] ss:$0 sm:$0xff] }
 0xaa2   :  { %v8650_v29 = vpop.eup %8649  ;;  %8236 = vmatpush3.msra.mxu1 %v9494_v45  ;;  %8223 = vmatmul.mubr.msk.f32.vlgmr.msra.gmra.mrb[74].mxu0 %vm458_vm2, %v4693_v26  ;;  %v9746_v16 = vld [vmem:[%s9877_s7 + $0x3] ss:$0 sm:$0xff] }
 0xaa3   :  { %v8652_v4 = vpop.eup %8651  ;;  %v4696_v27 = vmul.f32 %v8650_v29, %v8634_v33  ;;  %8231 = vmatpush3.msra.mxu0 %v9497_v32  ;;  %8237 = vmatprep.mubr.msk.f32.mxu1 %vm8734_vm1, %v8733_v34 }
 0xaa4   :  { %v4695_v6 = vmul.f32 %v8652_v4, %v8636_v41  ;;  %8245 = vmatprep.subr.mxu1 %v8733_v34  ;;  %8232 = vmatprep.mubr.msk.f32.mxu0 %vm8734_vm1, %v8733_v34 }
 0xaa5   :  { %8238 = vmatmul.mubr.msk.f32.vlgmr.msra.gmra.mrb[88].mxu1 %vm458_vm2, %v4696_v27  ;;  %8240 = vmatprep.subr.mxu0 %v8733_v34 }
 0xaa6   :  { %v8654_v45 = vpop.eup %8653  ;;  %8246 = vmatpush3.msra.mxu1 %v9500_v35  ;;  %8233 = vmatmul.mubr.msk.f32.vlgmr.msra.gmra.mrb[76].mxu0 %vm458_vm2, %v4695_v6 }
 0xaa7   :  { %v8656_v30 = vpop.eup %8655  ;;  %v4698_v32 = vmul.f32 %v8654_v45, %v8638_v48  ;;  %8241 = vmatpush3.msra.mxu0 %v9503_v40  ;;  %8247 = vmatprep.mubr.msk.f32.mxu1 %vm8734_vm1, %v8733_v34 }
 0xaa8   :  { %v4697_v28 = vmul.f32 %v8656_v30, %v8640_v14  ;;  %8255 = vmatprep.subr.mxu1 %v8733_v34  ;;  %8242 = vmatprep.mubr.msk.f32.mxu0 %vm8734_vm1, %v8733_v34 }
 0xaa9   :  { %8248 = vmatmul.mubr.msk.f32.vlgmr.msra.gmra.mrb[90].mxu1 %vm458_vm2, %v4698_v32  ;;  %8250 = vmatprep.subr.mxu0 %v8733_v34 }
 0xaaa   :  { %v8658_v35 = vpop.eup %8657  ;;  %8256 = vmatpush3.msra.mxu1 %v9506_v39  ;;  %8243 = vmatmul.mubr.msk.f32.vlgmr.msra.gmra.mrb[78].mxu0 %vm458_vm2, %v4697_v28  ;;  %v7366_v39 = vld [vmem:[%s9878_s8 + $0x10] sm:$0xff] }
 0xaab   :  { %v8660_v7 = vpop.eup %8659  ;;  %v4700_v40 = vmul.f32 %v8658_v35, %v8642_v56  ;;  %8251 = vmatpush3.msra.mxu0 %v9509_v44  ;;  %8257 = vmatprep.mubr.msk.f32.mxu1 %vm8734_vm1, %v8733_v34  ;;  %v7433_v44 = vld [vmem:[%s9874_s4 + $0x60] sm:$0xff] }
 0xaac   :  { %v4699_v11 = vmul.f32 %v8660_v7, %v8644_v57  ;;  %8252 = vmatprep.mubr.msk.f32.mxu0 %vm8734_vm1, %v8733_v34  ;;  %8260 = vmatprep.subr.mxu0 %v7366_v39  ;;  %v8508_v18 = vpack.c.bf16 %v7434_v10, %v7433_v44 }
 0xaad   :  { %8258 = vmatmul.mubr.msk.f32.vlgmr.msra.gmra.mrb[92].mxu1 %vm458_vm2, %v4700_v40 }
 0xaae   :  { %8253 = vmatmul.mubr.msk.f32.vlgmr.msra.gmra.mrb[80].mxu0 %vm458_vm2, %v4699_v11  ;;  %8282 = vmatprep.mubr.msk.f32.mxu1 %vm80_vm0, %v9298_v12  ;;  %v7430_v12 = vld [vmem:[%s9872_s2 + $0x68] sm:$0xff] }
 0xaaf   :  { %8261 = vmatpush3.msra.mxu0 %v7366_v39  ;;  %v8500_v8 = vpack.c.bf16 %v7430_v12, %v7429_v17 }
 0xab0   :  { %8509 = vmatprep.subr.bf16.mxu0 %v8508_v18 }
 0xab1   :  { %8501 = vmatprep.subr.bf16.mxu1 %v8500_v8 }
 0xab2   :  { %8503 = vmatpush3.bf16.msra.mxu1 %v8500_v8 }
 0xab3   :  { %8505 = vmatprep.subr.bf16.mxu1 %v8504_v20 }
 0xab6   :  { %8507 = vmatpush3.bf16.msra.mxu1 %v8504_v20 }
 0xab9   :  { %8283 = vmatmul.mubr.msk.f32.vlgmr.msra.gmra.mrb[94].mxu1 %vm80_vm0, %v9333_v31  ;;  %v7438_v31 = vld [vmem:[%s9876_s6 + $0x68] sm:$0xff] }
 0xaba   :  { %8285 = vmatprep.mubr.msk.f32.mxu1 %vm80_vm0, %v9340_v38  ;;  %v7439_v38 = vld [vmem:[%s9876_s6 + $0x70] sm:$0xff] }
 0xabd   :  { %8286 = vmatmul.mubr.msk.f32.gmra.mrb[96].mxu1 %vm80_vm0, %v9347_v36  ;;  %v8516_v36 = vpack.c.bf16 %v7438_v31, %v7437_v15 }
 0xabe   :  { %8288 = vmatprep.mubr.msk.f32.mxu1 %vm80_vm0, %v9354_v42  ;;  %v7440_v42 = vld [vmem:[%s9876_s6 + $0x78] sm:$0xff] }
 0xabf   :  { %8517 = vmatprep.subr.bf16.mxu1 %v8516_v36 }
 0xac0   :  { %8519 = vmatpush3.bf16.msra.mxu1 %v8516_v36 }
 0xac1   :  { %8289 = vmatmul.mubr.msk.f32.gmra.mrb[98].mxu1 %vm80_vm0, %v9361_v43  ;;  %v8520_v43 = vpack.c.bf16 %v7440_v42, %v7439_v38 }
 0xac2   :  { %8291 = vmatprep.mubr.msk.f32.mxu1 %vm80_vm0, %v9368_v9  ;;  %v7435_v9 = vld [vmem:[%s9874_s4 + $0x70] sm:$0xff] }
 0xac3   :  { %8521 = vmatprep.subr.bf16.mxu1 %v8520_v43 }
 0xac4   :  { %8523 = vmatpush3.bf16.msra.mxu1 %v8520_v43 }
 0xac5   :  { %8292 = vmatmul.mubr.msk.f32.gmra.mrb[100].mxu1 %vm80_vm0, %v9387_v22  ;;  %8344 = vmatprep.subr.mxu1 %v8733_v34  ;;  %v7436_v22 = vld [vmem:[%s9874_s4 + $0x78] sm:$0xff] }
 0xac6   :  { %8322 = vmatprep.mubr.msk.f32.mxu1 %vm80_vm0, %v9394_v5  ;;  %v8512_v46 = vpack.c.bf16 %v7436_v22, %v7435_v9 }
 0xac9   :  { %8323 = vmatmul.mubr.msk.f32.vlgmr.msra.gmra.mrb[102].mxu1 %vm80_vm0, %v9402_v21 }
 0xaca   :  { %8325 = vmatprep.mubr.msk.f32.mxu1 %vm80_vm0, %v9409_v49 }
 0xacd   :  { %8326 = vmatmul.mubr.msk.f32.gmra.mrb[104].mxu1 %vm80_vm0, %v9416_v50 }
 0xace   :  { %8328 = vmatprep.mubr.msk.f32.mxu1 %vm80_vm0, %v9423_v51 }
 0xad1   :  { %8329 = vmatmul.mubr.msk.f32.gmra.mrb[106].mxu1 %vm80_vm0, %v9430_v52 }
 0xad2   :  { %8331 = vmatprep.mubr.msk.f32.mxu1 %vm80_vm0, %v9437_v53 }
 0xad5   :  { %8332 = vmatmul.mubr.msk.f32.gmra.mrb[108].mxu1 %vm80_vm0, %v9444_v54 }
 0xad6   :  { %8346 = vmatprep.mubr.msk.f32.mxu1 %vm8734_vm1, %v8733_v34 }
 0xb74   :  { %v4843_v37 = vpop.f32.mrb[86].mxu1 }
 0xb75   :  { %v4770_v33 = vpop.f32.mrb[74].mxu0  ;;  %v8229_v41 = vpop.f32.mrb[87].mxu1 }
 0xb76   :  { %v8224_v47 = vpop.f32.mrb[75].mxu0  ;;  %8262 = vmatprep.mubr.msk.f32.mxu0 %vm458_vm2, %v4770_v33 }
 0xb77   :  { %8263 = vmatmul.mubr.msk.f32.vlgmr.msra.gmra.mrb[24].mxu0 %vm458_vm2, %v4843_v37 }
 0xb78   :  { %v4989_v48 = vpop.f32.mrb[88].mxu1  ;;  %8511 = vmatpush3.bf16.msra.mxu0 %v8508_v18 }
 0xb79   :  { %v4916_v14 = vpop.f32.mrb[76].mxu0  ;;  %v8239_v19 = vpop.f32.mrb[89].mxu1  ;;  %8513 = vmatprep.subr.bf16.mxu0 %v8512_v46 }
 0xb7a   :  { %v8234_v55 = vpop.f32.mrb[77].mxu0  ;;  %8265 = vmatprep.mubr.msk.f32.mxu0 %vm458_vm2, %v4916_v14 }
 0xb7b   :  { %8266 = vmatmul.mubr.msk.f32.gmra.mrb[26].mxu0 %vm458_vm2, %v4989_v48 }
 0xb7c   :  { %v5135_v56 = vpop.f32.mrb[90].mxu1  ;;  %8515 = vmatpush3.bf16.msra.mxu0 %v8512_v46 }
 0xb7d   :  { %v5062_v57 = vpop.f32.mrb[78].mxu0  ;;  %v8249_v58 = vpop.f32.mrb[91].mxu1  ;;  %8334 = vmatprep.subr.mxu0 %v8733_v34 }
 0xb7e   :  { %v8244_v59 = vpop.f32.mrb[79].mxu0  ;;  %8268 = vmatprep.mubr.msk.f32.mxu0 %vm458_vm2, %v5062_v57 }
 0xb7f   :  { %8269 = vmatmul.mubr.msk.f32.gmra.mrb[28].mxu0 %vm458_vm2, %v5135_v56 }
 0xb80   :  { %v5281_v60 = vpop.f32.mrb[92].mxu1 }
 0xb81   :  { %v5208_v61 = vpop.f32.mrb[80].mxu0  ;;  %v8259_v62 = vpop.f32.mrb[93].mxu1 }
 0xb82   :  { %v8254_v63 = vpop.f32.mrb[81].mxu0  ;;  %8271 = vmatprep.mubr.msk.f32.mxu0 %vm458_vm2, %v5208_v61 }
 0xb83   :  { %8272 = vmatmul.mubr.msk.f32.gmra.mrb[30].mxu0 %vm458_vm2, %v5281_v60 }
 0xb84   :  { %8302 = vmatprep.mubr.msk.f32.mxu0 %vm80_vm0, %v9394_v5 }
 0xb87   :  { %8303 = vmatmul.mubr.msk.f32.vlgmr.msra.gmra.mrb[82].mxu0 %vm80_vm0, %v9402_v21 }
 0xb88   :  { %8305 = vmatprep.mubr.msk.f32.mxu0 %vm80_vm0, %v9409_v49 }
 0xb8b   :  { %8306 = vmatmul.mubr.msk.f32.gmra.mrb[84].mxu0 %vm80_vm0, %v9416_v50 }
 0xb8c   :  { %8308 = vmatprep.mubr.msk.f32.mxu0 %vm80_vm0, %v9423_v51  ;;  %v8284_v5 = vpop.f32.mrb[94].mxu1 }
 0xb8d   :  { %v5513_v21 = vpop.f32.mrb[95].mxu1  ;;  %v5519_v7 = vadd.f32 %v8284_v5, %v7443_v3 }
 0xb8e   :  { %v5514_v27 = vadd.f32 %v7443_v3, %v5513_v21 }
 0xb8f   :  { %8309 = vmatmul.mubr.msk.f32.gmra.mrb[86].mxu0 %vm80_vm0, %v9430_v52 }
 0xb90   :  { %8311 = vmatprep.mubr.msk.f32.mxu0 %vm80_vm0, %v9437_v53  ;;  %v8287_v49 = vpop.f32.mrb[96].mxu1 }
 0xb91   :  { %v5523_v0 = vpop.f32.mrb[97].mxu1  ;;  %v5529_v18 = vadd.f32 %v8287_v49, %v7443_v3 }
 0xb92   :  { %v5524_v28 = vadd.f32 %v7443_v3, %v5523_v0 }
 0xb93   :  { %8312 = vmatmul.mubr.msk.f32.gmra.mrb[88].mxu0 %vm80_vm0, %v9444_v54  ;;  %v7453_v54 = vld [vmem:[%s9875_s5 + $0x3] ss:$0 sm:$0xff] }
 0xb94   :  { %8336 = vmatprep.mubr.msk.f32.mxu0 %vm8734_vm1, %v8733_v34  ;;  %v8290_v50 = vpop.f32.mrb[98].mxu1 }
 0xb95   :  { %v5533_v1 = vpop.f32.mrb[99].mxu1  ;;  %v5539_v20 = vadd.f32 %v8290_v50, %v7443_v3 }
 0xb96   :  { %v5534_v44 = vadd.f32 %v7443_v3, %v5533_v1 }
 0xb98   :  { %v9710_v23 = vpop.f32.mrb[100].mxu1 }
 0xb99   :  { %v5543_v51 = vpop.f32.mrb[101].mxu1  ;;  %v5549_v36 = vadd.f32 %v9710_v23, %v7443_v3 }
 0xb9a   :  { %v5544_v13 = vadd.f32 %v7443_v3, %v5543_v51 }
 0xb9c   :  { %v8324_v24 = vpop.f32.mrb[102].mxu1 }
 0xb9d   :  { %v5739_v52 = vpop.f32.mrb[103].mxu1  ;;  %v5745_v38 = vadd.f32 %v8324_v24, %v9746_v16 }
 0xb9e   :  { %v5740_v15 = vadd.f32 %v9746_v16, %v5739_v52 }
 0xba0   :  { %v9712_v25 = vpop.f32.mrb[104].mxu1 }
 0xba1   :  { %v9714_v53 = vpop.f32.mrb[105].mxu1 }
 0xba4   :  { %v9716_v2 = vpop.f32.mrb[106].mxu1 }
 0xba5   :  { %v9774_v42 = vpop.f32.mrb[107].mxu1 }
 0xba8   :  { %v9776_v43 = vpop.f32.mrb[108].mxu1 }
 0xba9   :  { %v9778_v9 = vpop.f32.mrb[109].mxu1 }
 0xc5a   :  { %v8304_v26 = vpop.f32.mrb[82].mxu0 }
 0xc5b   :  { %v5626_v29 = vpop.f32.mrb[83].mxu0  ;;  %v5632_v30 = vadd.f32 %v8304_v26, %v7453_v54 }
 0xc5c   :  { %v5627_v4 = vadd.f32 %v7453_v54, %v5626_v29 }
 0xc5e   :  { %v8307_v6 = vpop.f32.mrb[84].mxu0  ;;  %8335 = vmatpush3.xpose.msk.msra.mxu0 %vm458_vm2, %v5627_v4 }
 0xc5f   :  { %v5636_v45 = vpop.f32.mrb[85].mxu0  ;;  %8339 = vmatprep.subr.mxu0 %v8733_v34  ;;  %v5642_v11 = vadd.f32 %v8307_v6, %v7453_v54 }
 0xc60   :  { %v5637_v32 = vadd.f32 %v7453_v54, %v5636_v45 }
 0xc61   :  { %8337 = vmatmul.mubr.msk.f32.vlgmr.msra.gmra.mrb[90].mxu0 %vm458_vm2, %v5514_v27 }
 0xc62   :  { %v8310_v35 = vpop.f32.mrb[86].mxu0  ;;  %8340 = vmatpush3.xpose.msk.msra.mxu0 %vm458_vm2, %v5632_v30  ;;  %8345 = vmatpush3.xpose.msk.msra.mxu1 %vm458_vm2, %v5637_v32 }
 0xc63   :  { %v5646_v40 = vpop.f32.mrb[87].mxu0  ;;  %8341 = vmatprep.mubr.msk.f32.mxu0 %vm8734_vm1, %v8733_v34  ;;  %8349 = vmatprep.subr.mxu0 %v8733_v34  ;;  %v5652_v12 = vadd.f32 %v8310_v35, %v7453_v54 }
 0xc64   :  { %v5647_v39 = vadd.f32 %v7453_v54, %v5646_v40  ;;  %8354 = vmatprep.subr.mxu1 %v8733_v34 }
 0xc65   :  { %8342 = vmatmul.mubr.msk.f32.vlgmr.msra.gmra.mrb[92].mxu0 %vm458_vm2, %v5519_v7  ;;  %8347 = vmatmul.mubr.msk.f32.vlgmr.msra.gmra.mrb[110].mxu1 %vm458_vm2, %v5524_v28 }
 0xc66   :  { %v8313_v10 = vpop.f32.mrb[88].mxu0  ;;  %8350 = vmatpush3.xpose.msk.msra.mxu0 %vm458_vm2, %v5642_v11  ;;  %8355 = vmatpush3.xpose.msk.msra.mxu1 %vm458_vm2, %v5647_v39 }
 0xc67   :  { %v5656_v17 = vpop.f32.mrb[89].mxu0  ;;  %8351 = vmatprep.mubr.msk.f32.mxu0 %vm8734_vm1, %v8733_v34  ;;  %8356 = vmatprep.mubr.msk.f32.mxu1 %vm8734_vm1, %v8733_v34  ;;  %v5662_v31 = vadd.f32 %v8313_v10, %v7453_v54 }
 0xc68   :  { %v5657_v8 = vadd.f32 %v7453_v54, %v5656_v17  ;;  %8359 = vmatprep.subr.mxu0 %v8733_v34  ;;  %8364 = vmatprep.subr.mxu1 %v8733_v34 }
 0xc69   :  { %8352 = vmatmul.mubr.msk.f32.vlgmr.msra.gmra.mrb[94].mxu0 %vm458_vm2, %v5529_v18  ;;  %8357 = vmatmul.mubr.msk.f32.vlgmr.msra.gmra.mrb[112].mxu1 %vm458_vm2, %v5534_v44 }
 0xc6a   :  { %8360 = vmatpush3.xpose.msk.msra.mxu0 %vm458_vm2, %v5652_v12  ;;  %8365 = vmatpush3.xpose.msk.msra.mxu1 %vm458_vm2, %v5657_v8 }
 0xc6b   :  { %8361 = vmatprep.mubr.msk.f32.mxu0 %vm8734_vm1, %v8733_v34  ;;  %8366 = vmatprep.mubr.msk.f32.mxu1 %vm8734_vm1, %v8733_v34 }
 0xc6c   :  { %8369 = vmatprep.subr.mxu0 %v8733_v34  ;;  %8374 = vmatprep.subr.mxu1 %v8733_v34 }
 0xc6d   :  { %8362 = vmatmul.mubr.msk.f32.vlgmr.msra.gmra.mrb[96].mxu0 %vm458_vm2, %v5539_v20  ;;  %8367 = vmatmul.mubr.msk.f32.vlgmr.msra.gmra.mrb[114].mxu1 %vm458_vm2, %v5544_v13 }
 0xc6e   :  { %8370 = vmatpush3.xpose.msk.msra.mxu0 %vm458_vm2, %v5662_v31  ;;  %8371 = vmatprep.mubr.msk.f32.mxu0 %vm8734_vm1, %v8733_v34 }
 0xc6f   :  { %8379 = vmatprep.subr.mxu0 %v8733_v34  ;;  %8375 = vmatpush3.msra.mxu1 %v5740_v15 }
 0xc70   :  { %8376 = vmatprep.mubr.msk.f32.mxu1 %vm8734_vm1, %v8733_v34  ;;  %8384 = vmatprep.subr.mxu1 %v8733_v34 }
 0xc71   :  { %8372 = vmatmul.mubr.msk.f32.vlgmr.msra.gmra.mrb[98].mxu0 %vm458_vm2, %v5549_v36 }
 0xc72   :  { %8380 = vmatpush3.msra.mxu0 %v5745_v38  ;;  %8381 = vmatprep.mubr.msk.f32.mxu0 %vm8734_vm1, %v8733_v34 }
 0xc73   :  { %8389 = vmatprep.subr.mxu0 %v8733_v34 }
 0xd34   :  { %v5850_v22 = vpop.f32.mrb[90].mxu0 }
 0xd35   :  { %v6386_v37 = vsel %vm458_vm2, %v5850_v22, -inf  ;;  %v8338_v33 = vpop.f32.mrb[91].mxu0 }
 0xd36   :  { %6387 = vmax.xlane.f32.xlu0 %v6386_v37 }
 0xd38   :  { %v5926_v41 = vpop.f32.mrb[92].mxu0  ;;  %v6002_v46 = vpop.f32.mrb[110].mxu1 }
 0xd39   :  { %v6392_v47 = vsel %vm458_vm2, %v6002_v46, -inf  ;;  %v6389_v48 = vsel %vm458_vm2, %v5926_v41, -inf  ;;  %v8343_v14 = vpop.f32.mrb[93].mxu0  ;;  %v8348_v19 = vpop.f32.mrb[111].mxu1 }
 0xd3a   :  { %6393 = vmax.xlane.f32.xlu0 %v6392_v47  ;;  %6390 = vmax.xlane.f32.xlu1 %v6389_v48 }
 0xd3c   :  { %v6078_v55 = vpop.f32.mrb[94].mxu0  ;;  %v6154_v56 = vpop.f32.mrb[112].mxu1 }
 0xd3d   :  { %v6398_v57 = vsel %vm458_vm2, %v6154_v56, -inf  ;;  %v6395_v58 = vsel %vm458_vm2, %v6078_v55, -inf  ;;  %v8353_v59 = vpop.f32.mrb[95].mxu0  ;;  %v8358_v60 = vpop.f32.mrb[113].mxu1 }
 0xd3e   :  { %6399 = vmax.xlane.f32.xlu0 %v6398_v57  ;;  %6396 = vmax.xlane.f32.xlu1 %v6395_v58 }
 0xd40   :  { %v6230_v61 = vpop.f32.mrb[96].mxu0  ;;  %v6306_v62 = vpop.f32.mrb[114].mxu1 }
 0xd41   :  { %v6404_v63 = vsel %vm458_vm2, %v6306_v62, -inf  ;;  %v6401_v5 = vsel %vm458_vm2, %v6230_v61, -inf  ;;  %v8363_v21 = vpop.f32.mrb[97].mxu0  ;;  %v8368_v49 = vpop.f32.mrb[115].mxu1 }
 0xd42   :  { %6405 = vmax.xlane.f32.xlu0 %v6404_v63  ;;  %6402 = vmax.xlane.f32.xlu1 %v6401_v5 }
 0xd44   :  { %v6382_v0 = vpop.f32.mrb[98].mxu0 }
 0xd45   :  { %v6407_v50 = vsel %vm458_vm2, %v6382_v0, -inf  ;;  %v8373_v1 = vpop.f32.mrb[99].mxu0 }
 0xd46   :  { %6408 = vmax.xlane.f32.xlu1 %v6407_v50 }
 0xdc3   :  { %v6388_v23 = vpop.xlane.xlu0 %6387 }
 0xdc4   :  { %v6410_v51 = vsub.f32 %v5850_v22, %v6388_v23 }
 0xdc6   :  { %v6418_v24 = vmul.f32 1.442695, %v6410_v51 }
 0xdc7   :  { %v6394_v52 = vpop.xlane.xlu0 %6393  ;;  %v6391_v54 = vpop.xlane.xlu1 %6390 }
 0xdc8   :  { %8661 = vpow2.f32 %v6418_v24  ;;  %v6412_v26 = vsub.f32 %v6002_v46, %v6394_v52  ;;  %v6411_v3 = vsub.f32 %v5926_v41, %v6391_v54 }
 0xdca   :  { %v6422_v29 = vmul.f32 1.442695, %v6412_v26  ;;  %v6420_v4 = vmul.f32 1.442695, %v6411_v3 }
 0xdcb   :  { %v6400_v27 = vpop.xlane.xlu0 %6399  ;;  %v6397_v6 = vpop.xlane.xlu1 %6396 }
 0xdcc   :  { %8663 = vpow2.f32 %v6422_v29  ;;  %v6414_v45 = vsub.f32 %v6154_v56, %v6400_v27  ;;  %v6413_v30 = vsub.f32 %v6078_v55, %v6397_v6  ;;  %v7441_v27 = vld [vmem:[%s9878_s8 + $0x18] sm:$0xff] }
 0xdcd   :  { %8665 = vpow2.f32 %v6420_v4 }
 0xdce   :  { %v6426_v32 = vmul.f32 1.442695, %v6414_v45  ;;  %v6424_v28 = vmul.f32 1.442695, %v6413_v30 }
 0xdcf   :  { %v6406_v35 = vpop.xlane.xlu0 %6405  ;;  %v6403_v7 = vpop.xlane.xlu1 %6402 }
 0xdd0   :  { %8667 = vpow2.f32 %v6426_v32  ;;  %v6416_v40 = vsub.f32 %v6306_v62, %v6406_v35  ;;  %v6415_v11 = vsub.f32 %v6230_v61, %v6403_v7  ;;  %v5750_v62 = vadd.f32 %v9746_v16, %v9714_v53 }
 0xdd1   :  { %8669 = vpow2.f32 %v6424_v28  ;;  %v5755_v53 = vadd.f32 %v9712_v25, %v9746_v16  ;;  %v5765_v25 = vadd.f32 %v9716_v2, %v9746_v16  ;;  %v5775_v2 = vadd.f32 %v9776_v43, %v9746_v16 }
 0xdd2   :  { %v8662_v39 = vpop.eup %8661  ;;  %v6430_v44 = vmul.f32 1.442695, %v6416_v40  ;;  %v6428_v10 = vmul.f32 1.442695, %v6415_v11 }
 0xdd3   :  { %v6409_v18 = vpop.xlane.xlu1 %6408  ;;  %v6434_v17 = vsel %vm458_vm2, %v8662_v39, 0.0 }
 0xdd4   :  { %8671 = vpow2.f32 %v6430_v44  ;;  %v6417_v12 = vsub.f32 %v6382_v0, %v6409_v18  ;;  %6435 = vadd.xlane.f32.xlu0 %v6434_v17  ;;  %v5760_v0 = vadd.f32 %v9746_v16, %v9774_v42  ;;  %v5770_v42 = vadd.f32 %v9746_v16, %v9778_v9  ;;  %v7219_v17 = vld [vmem:[%s9879_s9] ss:$0 sm:$0xff]  ;;  %s8735_s9 = smov [#allocation2]  }
 0xdd5   :  { %8673 = vpow2.f32 %v6428_v10  ;;  %s7208_s15 = sshll.u32 %s8735_s9, 4  ;;  %s7209_s15 = int_to_ptr.vmem [resolvable:$true] %s7208_s15 }
 0xdd6   :  { %v8664_v8 = vpop.eup %8663  ;;  %v6432_v13 = vmul.f32 1.442695, %v6417_v12  ;;  %s8709_s16 = scalar_lea.vmem %s7209_s15, 1024  ;;  %p8714_p1 = scmp.lt.s32.totalorder %s7209_s15, %s7209_s15 }
 0xdd7   :  { %v8666_v20 = vpop.eup %8665  ;;  %v6440_v15 = vsel %vm458_vm2, %v8664_v8, 0.0  ;;  %p8710_p0 = scmp.ne.s32.totalorder %s7209_s15, %s8709_s16  ;;  %p8715_p2 = scmp.lt.s32.totalorder %s8709_s16, %s8709_s16 }
 0xdd8   :  { %8675 = vpow2.f32 %v6432_v13  ;;  %6441 = vadd.xlane.f32.xlu0 %v6440_v15  ;;  %v6437_v31 = vsel %vm458_vm2, %v8666_v20, 0.0 }
 0xdd9   :  { %6438 = vadd.xlane.f32.xlu1 %v6437_v31  ;;  %p8716_p3 = por %p8715_p2, %p8714_p1 }
 0xdda   :  { %v8668_v38 = vpop.eup %8667 }
 0xddb   :  { %v8670_v36 = vpop.eup %8669  ;;  %v6446_v22 = vsel %vm458_vm2, %v8668_v38, 0.0  ;;  %p8717_p4 = pnand %p8716_p3, %p8710_p0 }
 0xddc   :  { %6447 = vadd.xlane.f32.xlu0 %v6446_v22  ;;  %v6443_v37 = vsel %vm458_vm2, %v8670_v36, 0.0 }
 0xddd   :  { %6444 = vadd.xlane.f32.xlu1 %v6443_v37 }
 0xdde   :  { %v8672_v33 = vpop.eup %8671 }
 0xddf   :  { %v8674_v41 = vpop.eup %8673  ;;  %v6452_v46 = vsel %vm458_vm2, %v8672_v33, 0.0 }
 0xde0   :  { %6453 = vadd.xlane.f32.xlu0 %v6452_v46  ;;  %v6449_v47 = vsel %vm458_vm2, %v8674_v41, 0.0 }
 0xde1   :  { %6450 = vadd.xlane.f32.xlu1 %v6449_v47 }
 0xde2   :  { %v9795_v48 = vpop.eup %8675 }
 0xde3   :  { %v6455_v14 = vsel %vm458_vm2, %v9795_v48, 0.0 }
 0xde5   :  { %6456 = vadd.xlane.f32.xlu1 %v6455_v14 }
 0xe61   :  { %v6436_v19 = vpop.xlane.xlu0 %6435 }
 0xe62   :  { %8677 = vrcp.f32 %v6436_v19 }
 0xe65   :  { %v6442_v55 = vpop.xlane.xlu0 %6441 }
 0xe66   :  { %8679 = vrcp.f32 %v6442_v55  ;;  %v6439_v56 = vpop.xlane.xlu1 %6438 }
 0xe67   :  { %8681 = vrcp.f32 %v6439_v56 }
 0xe69   :  { %v6448_v57 = vpop.xlane.xlu0 %6447 }
 0xe6a   :  { %8683 = vrcp.f32 %v6448_v57  ;;  %v6445_v58 = vpop.xlane.xlu1 %6444 }
 0xe6b   :  { %8685 = vrcp.f32 %v6445_v58 }
 0xe6c   :  { %v8678_v59 = vpop.eup %8677 }
 0xe6d   :  { %v6466_v60 = vmul.f32 %v8678_v59, %v8662_v39  ;;  %v6454_v61 = vpop.xlane.xlu0 %6453 }
 0xe6e   :  { %8687 = vrcp.f32 %v6454_v61  ;;  %v6451_v63 = vpop.xlane.xlu1 %6450 }
 0xe6f   :  { %8689 = vrcp.f32 %v6451_v63  ;;  %8377 = vmatmul.mubr.msk.f32.vlgmr.msra.gmra.mrb[116].mxu1 %vm458_vm2, %v6466_v60 }
 0xe70   :  { %v8680_v5 = vpop.eup %8679  ;;  %8385 = vmatpush3.msra.mxu1 %v5750_v62  ;;  %8386 = vmatprep.mubr.msk.f32.mxu1 %vm8734_vm1, %v8733_v34 }
 0xe71   :  { %v8682_v21 = vpop.eup %8681  ;;  %v6468_v49 = vmul.f32 %v8680_v5, %v8664_v8  ;;  %8394 = vmatprep.subr.mxu1 %v8733_v34 }
 0xe72   :  { %v6467_v50 = vmul.f32 %v8682_v21, %v8666_v20  ;;  %v6457_v1 = vpop.xlane.xlu1 %6456 }
 0xe73   :  { %8691 = vrcp.f32 %v6457_v1  ;;  %8387 = vmatmul.mubr.msk.f32.vlgmr.msra.gmra.mrb[118].mxu1 %vm458_vm2, %v6468_v49 }
 0xe74   :  { %v8684_v23 = vpop.eup %8683  ;;  %8382 = vmatmul.mubr.msk.f32.vlgmr.msra.gmra.mrb[100].mxu0 %vm458_vm2, %v6467_v50  ;;  %8395 = vmatpush3.msra.mxu1 %v5760_v0 }
 0xe75   :  { %v8686_v51 = vpop.eup %8685  ;;  %v6470_v24 = vmul.f32 %v8684_v23, %v8668_v38  ;;  %8390 = vmatpush3.msra.mxu0 %v5755_v53  ;;  %8391 = vmatprep.mubr.msk.f32.mxu0 %vm8734_vm1, %v8733_v34 }
 0xe76   :  { %v6469_v52 = vmul.f32 %v8686_v51, %v8670_v36  ;;  %8396 = vmatprep.mubr.msk.f32.mxu1 %vm8734_vm1, %v8733_v34  ;;  %8399 = vmatprep.subr.mxu0 %v8733_v34 }
 0xe77   :  { %8404 = vmatprep.subr.mxu1 %v8733_v34  ;;  %8397 = vmatmul.mubr.msk.f32.vlgmr.msra.gmra.mrb[120].mxu1 %vm458_vm2, %v6470_v24 }
 0xe78   :  { %v8688_v54 = vpop.eup %8687  ;;  %8392 = vmatmul.mubr.msk.f32.vlgmr.msra.gmra.mrb[102].mxu0 %vm458_vm2, %v6469_v52  ;;  %8405 = vmatpush3.msra.mxu1 %v5770_v42 }
 0xe79   :  { %v8690_v26 = vpop.eup %8689  ;;  %v6472_v3 = vmul.f32 %v8688_v54, %v8672_v33  ;;  %8400 = vmatpush3.msra.mxu0 %v5765_v25  ;;  %8401 = vmatprep.mubr.msk.f32.mxu0 %vm8734_vm1, %v8733_v34 }
 0xe7a   :  { %v6471_v9 = vmul.f32 %v8690_v26, %v8674_v41  ;;  %8406 = vmatprep.mubr.msk.f32.mxu1 %vm8734_vm1, %v8733_v34  ;;  %8409 = vmatprep.subr.mxu0 %v8733_v34 }
 0xe7b   :  { %8407 = vmatmul.mubr.msk.f32.vlgmr.msra.gmra.mrb[122].mxu1 %vm458_vm2, %v6472_v3 }
 0xe7c   :  { %8402 = vmatmul.mubr.msk.f32.vlgmr.msra.gmra.mrb[104].mxu0 %vm458_vm2, %v6471_v9 }
 0xe7d   :  { %v8692_v29 = vpop.eup %8691  ;;  %8410 = vmatpush3.msra.mxu0 %v5775_v2  ;;  %8411 = vmatprep.mubr.msk.f32.mxu0 %vm8734_vm1, %v8733_v34 }
 0xe7e   :  { %v6473_v4 = vmul.f32 %v8692_v29, %v9795_v48  ;;  %8414 = vmatprep.subr.mxu0 %v7441_v27 }
 0xe80   :  { %8412 = vmatmul.mubr.msk.f32.vlgmr.msra.gmra.mrb[106].mxu0 %vm458_vm2, %v6473_v4 }
 0xe81   :  { %8415 = vmatpush3.msra.mxu0 %v7441_v27 }
 0xf42   :  { %v6543_v16 = vpop.f32.mrb[116].mxu1 }
 0xf43   :  { %v8378_v43 = vpop.f32.mrb[117].mxu1  ;;  %8416 = vmatprep.mubr.msk.f32.mxu0 %vm458_vm2, %v6543_v16 }
 0xf46   :  { %v6689_v6 = vpop.f32.mrb[118].mxu1 }
 0xf47   :  { %v6616_v45 = vpop.f32.mrb[100].mxu0  ;;  %v8388_v30 = vpop.f32.mrb[119].mxu1 }
 0xf48   :  { %v8383_v32 = vpop.f32.mrb[101].mxu0  ;;  %8417 = vmatmul.mubr.msk.f32.vlgmr.msra.gmra.mrb[24].mxu0 %vm458_vm2, %v6616_v45 }
 0xf49   :  { %8419 = vmatprep.mubr.msk.f32.mxu0 %vm458_vm2, %v6689_v6 }
 0xf4a   :  { %v6835_v34 = vpop.f32.mrb[120].mxu1 }
 0xf4b   :  { %v6762_v28 = vpop.f32.mrb[102].mxu0  ;;  %v8398_v35 = vpop.f32.mrb[121].mxu1 }
 0xf4c   :  { %v8393_v7 = vpop.f32.mrb[103].mxu0  ;;  %8420 = vmatmul.mubr.msk.f32.gmra.mrb[26].mxu0 %vm458_vm2, %v6762_v28 }
 0xf4d   :  { %8422 = vmatprep.mubr.msk.f32.mxu0 %vm458_vm2, %v6835_v34 }
 0xf4e   :  { %v6981_v40 = vpop.f32.mrb[122].mxu1 }
 0xf4f   :  { %v6908_v11 = vpop.f32.mrb[104].mxu0  ;;  %v8408_v39 = vpop.f32.mrb[123].mxu1 }
 0xf50   :  { %v8403_v44 = vpop.f32.mrb[105].mxu0  ;;  %8423 = vmatmul.mubr.msk.f32.gmra.mrb[28].mxu0 %vm458_vm2, %v6908_v11 }
 0xf51   :  { %8425 = vmatprep.mubr.msk.f32.mxu0 %vm458_vm2, %v6981_v40 }
 0xf53   :  { %v7054_v10 = vpop.f32.mrb[106].mxu0 }
 0xf54   :  { %v8413_v18 = vpop.f32.mrb[107].mxu0  ;;  %8426 = vmatmul.mubr.msk.f32.gmra.mrb[30].mxu0 %vm458_vm2, %v7054_v10 }
0x101b   :  { %v8418_v12 = vpop.f32.mrb[24].mxu0 }
0x101c   :  { %v8528_v8 = vadd.f32 %v8418_v12, %v7219_v17  ;;  %v7148_v13 = vpop.f32.mrb[25].mxu0 }
0x101d   :  { %v8529_v20 = vadd.f32 %v7219_v17, %v7148_v13 }
0x101e   :  { %7196 = vst.msk [vmem:[#allocation2 + $0x8] sm:$0xff] %vm80_vm0, %v8528_v8 }
0x101f   :  { %7195 = vst.msk [vmem:[#allocation2] sm:$0xff] %vm80_vm0, %v8529_v20  ;;  %v8421_v15 = vpop.f32.mrb[26].mxu0 }
0x1020   :  { %v8530_v31 = vadd.f32 %v8421_v15, %v7219_v17  ;;  %v7158_v38 = vpop.f32.mrb[27].mxu0 }
0x1021   :  { %v8531_v36 = vadd.f32 %v7219_v17, %v7158_v38 }
0x1022   :  { %7198 = vst.msk [vmem:[#allocation2 + $0x18] sm:$0xff] %vm80_vm0, %v8530_v31 }
0x1023   :  { %7197 = vst.msk [vmem:[#allocation2 + $0x10] sm:$0xff] %vm80_vm0, %v8531_v36  ;;  %v8424_v22 = vpop.f32.mrb[28].mxu0 }
0x1024   :  { %v8532_v37 = vadd.f32 %v8424_v22, %v7219_v17  ;;  %v7168_v33 = vpop.f32.mrb[29].mxu0 }
0x1025   :  { %v8533_v41 = vadd.f32 %v7219_v17, %v7168_v33 }
0x1026   :  { %7200 = vst.msk [vmem:[#allocation2 + $0x28] sm:$0xff] %vm80_vm0, %v8532_v37 }
0x1027   :  { %7199 = vst.msk [vmem:[#allocation2 + $0x20] sm:$0xff] %vm80_vm0, %v8533_v41  ;;  %v8427_v46 = vpop.f32.mrb[30].mxu0 }
0x1028   :  { %v8534_v47 = vadd.f32 %v8427_v46, %v7219_v17  ;;  %v7178_v48 = vpop.f32.mrb[31].mxu0 }
0x1029   :  { %v8535_v14 = vadd.f32 %v7219_v17, %v7178_v48 }
0x102a   :  { %7202 = vst.msk [vmem:[#allocation2 + $0x38] sm:$0xff] %vm80_vm0, %v8534_v47 }
0x102b   :  { %7201 = vst.msk [vmem:[#allocation2 + $0x30] sm:$0xff] %vm80_vm0, %v8535_v14 }
0x102c   :  { %8720 = shalt.err (!%p8717_p4)
}
0x102d   :  { %s8721_s19 = scalar_lea.hbm %s9880_s10, 1024 }
0x102e   :  { %p8722_p5 = scmp.ne.s32.totalorder %s9880_s10, %s8721_s19  ;;  %p8725_p6 = scmp.lt.u32.totalorder %s8721_s19, %s9880_s10 }
0x1030   :  { %p8727_p7 = pnand %p8725_p6, %p8722_p5 }
0x1032   :  { %8730 = shalt.err (!%p8727_p7)
}
0x1033   :  { %s8736_s23 = smov 128   ;;  %s8737_s1 = smov 8  }
0x1034   :  { %7214 = dma.vmem_to_hbm [thread:$0]  %s7209_s15, 1024, %s9880_s10, [#allocation3], %s8736_s23, %s8736_s23, %s8737_s1  }
0x1035   :  { %8731 = dma.done.wait [#allocation3], 1024  }
0x1036   :  { %8732 = vsyncadd [#allocation3], 4294966272 }
0x1037   :  { %7218 = vsyncpa [#allocation3], 1 }

</bundles_post_ra>
